<compile_context>
chip_gen: v7x
topology: tpu7x:2x2x1
jax: 0.10.0
libtpu: 0.0.40
codegen_flags: <defaults>
</compile_context>

<pallas_src>
import functools

import jax
import jax.numpy as jnp
from jax.experimental import pallas as pl
from jax.experimental.pallas import tpu as pltpu  # noqa: F401  (TPU backend)


# ----------------------------- fused kernel ---------------------------------

def _make_fused_kernel(has_ds, kernel_size, T, min_std):
    """Builds the fused kernel.

    has_ds: tuple[bool] per layer - whether a 1x1 downsample conv exists.
    kernel_size: conv kernel size K (static).
    T: sequence length (static); batch is folded into rows, so row r belongs
       to sequence position r mod T.
    """
    K = kernel_size
    nlayers = len(has_ds)

    def kernel(x_ref, *refs):
        refs = list(refs)
        out_ref = refs.pop()                      # single output: (B*T, 2*Y)
        wm, bm, ws, bs = refs[-4:]
        wrefs = refs[:-4]

        x = x_ref[...]                            # (B*T, C0), float32
        BT = x.shape[0]

        # Row-within-sequence index (computed once, reused for every shift).
        rmod = jax.lax.broadcasted_iota(jnp.int32, (BT, 1), 0) % T

        def shift_rows(v, s):
            # out[r] = v[r - s] if (r mod T) >= s else 0  (causal, per-batch)
            if s == 0:
                return v
            if s >= T:
                return jnp.zeros_like(v)
            vs = jnp.concatenate(
                [jnp.zeros((s, v.shape[1]), v.dtype), v[:BT - s, :]], axis=0)
            return jnp.where(rmod >= s, vs, jnp.zeros_like(vs))

        def causal_conv(v, wc_ref, b_ref, d):
            # Merge the K taps into one wide MXU matmul.
            taps = [shift_rows(v, (K - 1 - k) * d) for k in range(K)]
            vk = taps[0] if K == 1 else jnp.concatenate(taps, axis=-1)
            return (jnp.dot(vk, wc_ref[...],
                            preferred_element_type=jnp.float32) + b_ref[...])

        h = x
        idx = 0
        for i in range(nlayers):
            d = 2 ** i
            wc1, b1, wc2, b2 = wrefs[idx:idx + 4]
            idx += 4
            o = jnp.maximum(causal_conv(h, wc1, b1, d), 0.0)
            o = jnp.maximum(causal_conv(o, wc2, b2, d), 0.0)
            if has_ds[i]:
                wd, bd = wrefs[idx:idx + 2]
                idx += 2
                res = (jnp.dot(h, wd[...],
                               preferred_element_type=jnp.float32) + bd[...])
            else:
                res = h
            h = jnp.maximum(o + res, 0.0)

        mean = jnp.dot(h, wm[...], preferred_element_type=jnp.float32) + bm[...]
        log_sigma = (jnp.dot(h, ws[...], preferred_element_type=jnp.float32)
                     + bs[...])
        sigma = min_std + (1.0 - min_std) * jax.nn.softplus(log_sigma)

        # Single output slab [mean | sigma] -> one store stream.
        out_ref[...] = jnp.concatenate([mean, sigma], axis=-1).astype(out_ref.dtype)

    return kernel


# ----------------------------- param prep (hoisted) --------------------------

def prepare_tcn_params(params):
    """Precompute kernel-ready weights ONCE (tap-concat, transpose, reshape)."""
    flat = []
    has_ds = []
    K = params["blocks"][0]["w1"].shape[2]
    for blk in params["blocks"]:
        Cout = blk["w1"].shape[0]
        wc1 = jnp.concatenate([blk["w1"][:, :, k].T for k in range(K)], axis=0)
        wc2 = jnp.concatenate([blk["w2"][:, :, k].T for k in range(K)], axis=0)
        flat += [wc1, blk["b1"].reshape(1, Cout),
                 wc2, blk["b2"].reshape(1, Cout)]
        ds = "wd" in blk
        has_ds.append(ds)
        if ds:
            flat += [blk["wd"][:, :, 0].T, blk["bd"].reshape(1, Cout)]
    Y = params["wm"].shape[0]
    flat += [params["wm"].T, params["bm"].reshape(1, Y),
             params["ws"].T, params["bs"].reshape(1, Y)]
    return tuple(flat), tuple(has_ds), K


# ----------------------------- model wrapper --------------------------------

@functools.partial(jax.jit, static_argnames=("has_ds", "kernel_size", "min_std"))
def tcn_seq_forward(flat_weights, past_x, past_y, future_x, *,
                    has_ds, kernel_size, min_std=0.01):
    """Returns (mean, sigma) of the predictive Normal on the future steps."""
    B, S, _ = future_x.shape
    steps = past_y.shape[1]
    future_y_fake = jnp.repeat(past_y[:, -1:, :], S, axis=1)
    context = jnp.concatenate([past_x, past_y], axis=-1)
    target = jnp.concatenate([future_x, future_y_fake], axis=-1)
    x = jnp.concatenate([context, target], axis=1)            # (B, T, C0)
    B, T, C0 = x.shape
    x2 = x.reshape(B * T, C0)

    Y = flat_weights[-1].shape[1]                             # head bias (1, Y)

    kernel = _make_fused_kernel(has_ds, kernel_size, T, min_std)
    out = pl.pallas_call(
        kernel,
        out_shape=jax.ShapeDtypeStruct((B * T, 2 * Y), x.dtype),
    )(x2, *flat_weights)

    out = out.reshape(B, T, 2 * Y)[:, steps:, :]
    return out[..., :Y], out[..., Y:]


def init_tcn_seq_params(key, x_dim, y_dim, hidden_size, nlayers, kernel_size):
    """Deterministic synthetic weights with the same shapes as the torch module."""
    c_in = x_dim + y_dim
    params = {"blocks": []}
    k = key

    def nxt():
        nonlocal k
        k, sub = jax.random.split(k)
        return sub

    for i in range(nlayers):
        cin = c_in if i == 0 else hidden_size
        cout = hidden_size
        blk = {
            "w1": 0.1 * jax.random.normal(nxt(), (cout, cin, kernel_size), jnp.float32),
            "b1": 0.1 * jax.random.normal(nxt(), (cout,), jnp.float32),
            "w2": 0.1 * jax.random.normal(nxt(), (cout, cout, kernel_size), jnp.float32),
            "b2": 0.1 * jax.random.normal(nxt(), (cout,), jnp.float32),
        }
        if cin != cout:  # downsample 1x1 conv
            blk["wd"] = 0.1 * jax.random.normal(nxt(), (cout, cin, 1), jnp.float32)
            blk["bd"] = 0.1 * jax.random.normal(nxt(), (cout,), jnp.float32)
        params["blocks"].append(blk)

    params["wm"] = 0.1 * jax.random.normal(nxt(), (y_dim, hidden_size), jnp.float32)
    params["bm"] = 0.1 * jax.random.normal(nxt(), (y_dim,), jnp.float32)
    params["ws"] = 0.1 * jax.random.normal(nxt(), (y_dim, hidden_size), jnp.float32)
    params["bs"] = 0.1 * jax.random.normal(nxt(), (y_dim,), jnp.float32)
    return params


# ----------------------------- pure-JAX reference ----------------------------

def _ref_causal_conv(x, w, b, dilation):
    B, T, _ = x.shape
    Cout, _, K = w.shape
    out = jnp.broadcast_to(b, (B, T, Cout)).astype(jnp.float32)
    for k_ in range(K):
        shift = (K - 1 - k_) * dilation
        if shift >= T:
            continue
        xs = x if shift == 0 else jnp.pad(x, ((0, 0), (shift, 0), (0, 0)))[:, :T, :]
        out = out + jnp.einsum("btc,oc->bto", xs, w[:, :, k_])
    return out


def _ref_forward(params, past_x, past_y, future_x, min_std=0.01):
    B, S, _ = future_x.shape
    steps = past_y.shape[1]
    fy = jnp.repeat(past_y[:, -1:, :], S, axis=1)
    x = jnp.concatenate(
        [jnp.concatenate([past_x, past_y], -1),
         jnp.concatenate([future_x, fy], -1)], axis=1)
    h = x
    for i, blk in enumerate(params["blocks"]):
        d = 2 ** i
        o = jax.nn.relu(_ref_causal_conv(h, blk["w1"], blk["b1"], d))
        o = jax.nn.relu(_ref_causal_conv(o, blk["w2"], blk["b2"], d))
        res = h if "wd" not in blk else _ref_causal_conv(h, blk["wd"], blk["bd"], 1)
        h = jax.nn.relu(o + res)
    mean = h @ params["wm"].T + params["bm"]
    log_sigma = h @ params["ws"].T + params["bs"]
    sigma = min_std + (1 - min_std) * jax.nn.softplus(log_sigma)
    return mean[:, steps:, :], sigma[:, steps:, :]


# ----------------------------- main ------------------------------------------

if __name__ == "__main__":
    key = jax.random.PRNGKey(0)
    x_dim, y_dim, hidden, nlayers, ksize = 3, 2, 32, 4, 2
    B, S_past, S_future = 2, 8, 8

    kp, kx1, ky1, kx2 = jax.random.split(key, 4)
    params = init_tcn_seq_params(kp, x_dim, y_dim, hidden, nlayers, ksize)
    flat_weights, has_ds, K = prepare_tcn_params(params)

    past_x = jax.random.normal(kx1, (B, S_past, x_dim), jnp.float32)
    past_y = jax.random.normal(ky1, (B, S_past, y_dim), jnp.float32)
    future_x = jax.random.normal(kx2, (B, S_future, x_dim), jnp.float32)

    mean, sigma = tcn_seq_forward(flat_weights, past_x, past_y, future_x,
                                  has_ds=has_ds, kernel_size=K)
    jax.block_until_ready((mean, sigma))

    ref_mean, ref_sigma = _ref_forward(params, past_x, past_y, future_x)
    assert mean.shape == (B, S_future, y_dim) and sigma.shape == (B, S_future, y_dim)
    assert jnp.allclose(mean, ref_mean, atol=1e-4, rtol=1e-4)
    assert jnp.allclose(sigma, ref_sigma, atol=1e-4, rtol=1e-4)

    print("KERNEL_OK")
</pallas_src>

<mosaic_0001>
module attributes {stable_mosaic.version = 11 : i64} {
  func.func @kernel(%arg0: memref<32x5xf32, #tpu.memory_space<vmem>>, %arg1: memref<10x32xf32, #tpu.memory_space<vmem>>, %arg2: memref<1x32xf32, #tpu.memory_space<vmem>>, %arg3: memref<64x32xf32, #tpu.memory_space<vmem>>, %arg4: memref<1x32xf32, #tpu.memory_space<vmem>>, %arg5: memref<5x32xf32, #tpu.memory_space<vmem>>, %arg6: memref<1x32xf32, #tpu.memory_space<vmem>>, %arg7: memref<64x32xf32, #tpu.memory_space<vmem>>, %arg8: memref<1x32xf32, #tpu.memory_space<vmem>>, %arg9: memref<64x32xf32, #tpu.memory_space<vmem>>, %arg10: memref<1x32xf32, #tpu.memory_space<vmem>>, %arg11: memref<64x32xf32, #tpu.memory_space<vmem>>, %arg12: memref<1x32xf32, #tpu.memory_space<vmem>>, %arg13: memref<64x32xf32, #tpu.memory_space<vmem>>, %arg14: memref<1x32xf32, #tpu.memory_space<vmem>>, %arg15: memref<64x32xf32, #tpu.memory_space<vmem>>, %arg16: memref<1x32xf32, #tpu.memory_space<vmem>>, %arg17: memref<64x32xf32, #tpu.memory_space<vmem>>, %arg18: memref<1x32xf32, #tpu.memory_space<vmem>>, %arg19: memref<32x2xf32, #tpu.memory_space<vmem>>, %arg20: memref<1x2xf32, #tpu.memory_space<vmem>>, %arg21: memref<32x2xf32, #tpu.memory_space<vmem>>, %arg22: memref<1x2xf32, #tpu.memory_space<vmem>>, %arg23: memref<32x4xf32, #tpu.memory_space<vmem>>) attributes {dimension_semantics = [], scalar_prefetch = 0 : i64, scratch_operands = 0 : i64, tpu.core_type = #tpu.core_type<tc>} {
    %c0 = arith.constant 0 : index
    %c0_0 = arith.constant 0 : index
    %0 = vector.load %arg0[%c0, %c0_0] : memref<32x5xf32, #tpu.memory_space<vmem>>, vector<32x5xf32>
    %1 = tpu.iota {dimensions = array<i32: 0>} : vector<32x1xi32>
    %c16_i32 = arith.constant 16 : i32
    %c0_i32 = arith.constant 0 : i32
    %2 = arith.cmpi eq, %c16_i32, %c0_i32 : i32
    %c1_i32 = arith.constant 1 : i32
    %3 = arith.select %2, %c1_i32, %c16_i32 : i32
    %4 = vector.broadcast %3 : i32 to vector<32x1xi32>
    %5 = arith.remsi %1, %4 : vector<32x1xi32>
    %c0_i32_1 = arith.constant 0 : i32
    %6 = vector.broadcast %c0_i32_1 : i32 to vector<32x1xi32>
    %7 = arith.cmpi ne, %5, %6 : vector<32x1xi32>
    %c0_i32_2 = arith.constant 0 : i32
    %8 = vector.broadcast %c0_i32_2 : i32 to vector<32x1xi32>
    %9 = arith.cmpi slt, %5, %8 : vector<32x1xi32>
    %c0_i32_3 = arith.constant 0 : i32
    %10 = arith.cmpi slt, %3, %c0_i32_3 : i32
    %11 = vector.broadcast %10 : i1 to vector<32x1xi1>
    %12 = vector.broadcast %11 : vector<32x1xi1> to vector<32x1xi1>
    %13 = arith.xori %9, %12 : vector<32x1xi1>
    %14 = arith.andi %13, %7 : vector<32x1xi1>
    %15 = vector.broadcast %3 : i32 to vector<32x1xi32>
    %16 = arith.addi %5, %15 : vector<32x1xi32>
    %17 = arith.select %14, %16, %5 : vector<32x1xi1>, vector<32x1xi32>
    %cst = arith.constant 0.000000e+00 : f32
    %18 = vector.broadcast %cst : f32 to vector<1x5xf32>
    %19 = vector.extract_strided_slice %0 {offsets = [0, 0], sizes = [31, 5], strides = [1, 1]} : vector<32x5xf32> to vector<31x5xf32>
    %20 = tpu.concatenate %18, %19 in 0 : vector<1x5xf32>, vector<31x5xf32> -> vector<32x5xf32>
    %c1_i32_4 = arith.constant 1 : i32
    %21 = vector.broadcast %c1_i32_4 : i32 to vector<32x1xi32>
    %22 = arith.cmpi sge, %17, %21 : vector<32x1xi32>
    %cst_5 = arith.constant 0.000000e+00 : f32
    %23 = vector.broadcast %cst_5 : f32 to vector<32x5xf32>
    %24 = vector.shape_cast %22 : vector<32x1xi1> to vector<32x1xi1>
    %25 = vector.broadcast %24 : vector<32x1xi1> to vector<32x5xi1>
    %26 = arith.select %25, %20, %23 : vector<32x5xi1>, vector<32x5xf32>
    %27 = tpu.concatenate %26, %0 in 1 : vector<32x5xf32>, vector<32x5xf32> -> vector<32x10xf32>
    %c0_6 = arith.constant 0 : index
    %c0_7 = arith.constant 0 : index
    %28 = vector.load %arg1[%c0_6, %c0_7] : memref<10x32xf32, #tpu.memory_space<vmem>>, vector<10x32xf32>
    %cst_8 = arith.constant dense<0.000000e+00> : vector<32x32xf32>
    %29 = tpu.matmul %27, %28, %cst_8 {dimension_numbers = #tpu.dot_dimension_numbers<[1], [0], [0], [1], [0, 0, 1, 1], [], []>} : vector<32x10xf32>, vector<10x32xf32>, vector<32x32xf32> -> vector<32x32xf32>
    %c0_9 = arith.constant 0 : index
    %c0_10 = arith.constant 0 : index
    %30 = vector.load %arg2[%c0_9, %c0_10] : memref<1x32xf32, #tpu.memory_space<vmem>>, vector<1x32xf32>
    %31 = vector.broadcast %30 : vector<1x32xf32> to vector<32x32xf32>
    %32 = arith.addf %29, %31 : vector<32x32xf32>
    %cst_11 = arith.constant 0.000000e+00 : f32
    %33 = vector.broadcast %cst_11 : f32 to vector<32x32xf32>
    %34 = arith.maximumf %32, %33 : vector<32x32xf32>
    %cst_12 = arith.constant 0.000000e+00 : f32
    %35 = vector.broadcast %cst_12 : f32 to vector<1x32xf32>
    %36 = vector.extract_strided_slice %34 {offsets = [0, 0], sizes = [31, 32], strides = [1, 1]} : vector<32x32xf32> to vector<31x32xf32>
    %37 = tpu.concatenate %35, %36 in 0 : vector<1x32xf32>, vector<31x32xf32> -> vector<32x32xf32>
    %c1_i32_13 = arith.constant 1 : i32
    %38 = vector.broadcast %c1_i32_13 : i32 to vector<32x1xi32>
    %39 = arith.cmpi sge, %17, %38 : vector<32x1xi32>
    %cst_14 = arith.constant 0.000000e+00 : f32
    %40 = vector.broadcast %cst_14 : f32 to vector<32x32xf32>
    %41 = vector.shape_cast %39 : vector<32x1xi1> to vector<32x1xi1>
    %42 = vector.broadcast %41 : vector<32x1xi1> to vector<32x32xi1>
    %43 = arith.select %42, %37, %40 : vector<32x32xi1>, vector<32x32xf32>
    %44 = tpu.concatenate %43, %34 in 1 : vector<32x32xf32>, vector<32x32xf32> -> vector<32x64xf32>
    %c0_15 = arith.constant 0 : index
    %c0_16 = arith.constant 0 : index
    %45 = vector.load %arg3[%c0_15, %c0_16] : memref<64x32xf32, #tpu.memory_space<vmem>>, vector<64x32xf32>
    %cst_17 = arith.constant dense<0.000000e+00> : vector<32x32xf32>
    %46 = tpu.matmul %44, %45, %cst_17 {dimension_numbers = #tpu.dot_dimension_numbers<[1], [0], [0], [1], [0, 0, 1, 1], [], []>} : vector<32x64xf32>, vector<64x32xf32>, vector<32x32xf32> -> vector<32x32xf32>
    %c0_18 = arith.constant 0 : index
    %c0_19 = arith.constant 0 : index
    %47 = vector.load %arg4[%c0_18, %c0_19] : memref<1x32xf32, #tpu.memory_space<vmem>>, vector<1x32xf32>
    %48 = vector.broadcast %47 : vector<1x32xf32> to vector<32x32xf32>
    %49 = arith.addf %46, %48 : vector<32x32xf32>
    %cst_20 = arith.constant 0.000000e+00 : f32
    %50 = vector.broadcast %cst_20 : f32 to vector<32x32xf32>
    %51 = arith.maximumf %49, %50 : vector<32x32xf32>
    %c0_21 = arith.constant 0 : index
    %c0_22 = arith.constant 0 : index
    %52 = vector.load %arg5[%c0_21, %c0_22] : memref<5x32xf32, #tpu.memory_space<vmem>>, vector<5x32xf32>
    %cst_23 = arith.constant dense<0.000000e+00> : vector<32x32xf32>
    %53 = tpu.matmul %0, %52, %cst_23 {dimension_numbers = #tpu.dot_dimension_numbers<[1], [0], [0], [1], [0, 0, 1, 1], [], []>} : vector<32x5xf32>, vector<5x32xf32>, vector<32x32xf32> -> vector<32x32xf32>
    %c0_24 = arith.constant 0 : index
    %c0_25 = arith.constant 0 : index
    %54 = vector.load %arg6[%c0_24, %c0_25] : memref<1x32xf32, #tpu.memory_space<vmem>>, vector<1x32xf32>
    %55 = vector.broadcast %54 : vector<1x32xf32> to vector<32x32xf32>
    %56 = arith.addf %53, %55 : vector<32x32xf32>
    %57 = arith.addf %51, %56 : vector<32x32xf32>
    %cst_26 = arith.constant 0.000000e+00 : f32
    %58 = vector.broadcast %cst_26 : f32 to vector<32x32xf32>
    %59 = arith.maximumf %57, %58 : vector<32x32xf32>
    %cst_27 = arith.constant 0.000000e+00 : f32
    %60 = vector.broadcast %cst_27 : f32 to vector<2x32xf32>
    %61 = vector.extract_strided_slice %59 {offsets = [0, 0], sizes = [30, 32], strides = [1, 1]} : vector<32x32xf32> to vector<30x32xf32>
    %62 = tpu.concatenate %60, %61 in 0 : vector<2x32xf32>, vector<30x32xf32> -> vector<32x32xf32>
    %c2_i32 = arith.constant 2 : i32
    %63 = vector.broadcast %c2_i32 : i32 to vector<32x1xi32>
    %64 = arith.cmpi sge, %17, %63 : vector<32x1xi32>
    %cst_28 = arith.constant 0.000000e+00 : f32
    %65 = vector.broadcast %cst_28 : f32 to vector<32x32xf32>
    %66 = vector.shape_cast %64 : vector<32x1xi1> to vector<32x1xi1>
    %67 = vector.broadcast %66 : vector<32x1xi1> to vector<32x32xi1>
    %68 = arith.select %67, %62, %65 : vector<32x32xi1>, vector<32x32xf32>
    %69 = tpu.concatenate %68, %59 in 1 : vector<32x32xf32>, vector<32x32xf32> -> vector<32x64xf32>
    %c0_29 = arith.constant 0 : index
    %c0_30 = arith.constant 0 : index
    %70 = vector.load %arg7[%c0_29, %c0_30] : memref<64x32xf32, #tpu.memory_space<vmem>>, vector<64x32xf32>
    %cst_31 = arith.constant dense<0.000000e+00> : vector<32x32xf32>
    %71 = tpu.matmul %69, %70, %cst_31 {dimension_numbers = #tpu.dot_dimension_numbers<[1], [0], [0], [1], [0, 0, 1, 1], [], []>} : vector<32x64xf32>, vector<64x32xf32>, vector<32x32xf32> -> vector<32x32xf32>
    %c0_32 = arith.constant 0 : index
    %c0_33 = arith.constant 0 : index
    %72 = vector.load %arg8[%c0_32, %c0_33] : memref<1x32xf32, #tpu.memory_space<vmem>>, vector<1x32xf32>
    %73 = vector.broadcast %72 : vector<1x32xf32> to vector<32x32xf32>
    %74 = arith.addf %71, %73 : vector<32x32xf32>
    %cst_34 = arith.constant 0.000000e+00 : f32
    %75 = vector.broadcast %cst_34 : f32 to vector<32x32xf32>
    %76 = arith.maximumf %74, %75 : vector<32x32xf32>
    %cst_35 = arith.constant 0.000000e+00 : f32
    %77 = vector.broadcast %cst_35 : f32 to vector<2x32xf32>
    %78 = vector.extract_strided_slice %76 {offsets = [0, 0], sizes = [30, 32], strides = [1, 1]} : vector<32x32xf32> to vector<30x32xf32>
    %79 = tpu.concatenate %77, %78 in 0 : vector<2x32xf32>, vector<30x32xf32> -> vector<32x32xf32>
    %c2_i32_36 = arith.constant 2 : i32
    %80 = vector.broadcast %c2_i32_36 : i32 to vector<32x1xi32>
    %81 = arith.cmpi sge, %17, %80 : vector<32x1xi32>
    %cst_37 = arith.constant 0.000000e+00 : f32
    %82 = vector.broadcast %cst_37 : f32 to vector<32x32xf32>
    %83 = vector.shape_cast %81 : vector<32x1xi1> to vector<32x1xi1>
    %84 = vector.broadcast %83 : vector<32x1xi1> to vector<32x32xi1>
    %85 = arith.select %84, %79, %82 : vector<32x32xi1>, vector<32x32xf32>
    %86 = tpu.concatenate %85, %76 in 1 : vector<32x32xf32>, vector<32x32xf32> -> vector<32x64xf32>
    %c0_38 = arith.constant 0 : index
    %c0_39 = arith.constant 0 : index
    %87 = vector.load %arg9[%c0_38, %c0_39] : memref<64x32xf32, #tpu.memory_space<vmem>>, vector<64x32xf32>
    %cst_40 = arith.constant dense<0.000000e+00> : vector<32x32xf32>
    %88 = tpu.matmul %86, %87, %cst_40 {dimension_numbers = #tpu.dot_dimension_numbers<[1], [0], [0], [1], [0, 0, 1, 1], [], []>} : vector<32x64xf32>, vector<64x32xf32>, vector<32x32xf32> -> vector<32x32xf32>
    %c0_41 = arith.constant 0 : index
    %c0_42 = arith.constant 0 : index
    %89 = vector.load %arg10[%c0_41, %c0_42] : memref<1x32xf32, #tpu.memory_space<vmem>>, vector<1x32xf32>
    %90 = vector.broadcast %89 : vector<1x32xf32> to vector<32x32xf32>
    %91 = arith.addf %88, %90 : vector<32x32xf32>
    %cst_43 = arith.constant 0.000000e+00 : f32
    %92 = vector.broadcast %cst_43 : f32 to vector<32x32xf32>
    %93 = arith.maximumf %91, %92 : vector<32x32xf32>
    %94 = arith.addf %93, %59 : vector<32x32xf32>
    %cst_44 = arith.constant 0.000000e+00 : f32
    %95 = vector.broadcast %cst_44 : f32 to vector<32x32xf32>
    %96 = arith.maximumf %94, %95 : vector<32x32xf32>
    %cst_45 = arith.constant 0.000000e+00 : f32
    %97 = vector.broadcast %cst_45 : f32 to vector<4x32xf32>
    %98 = vector.extract_strided_slice %96 {offsets = [0, 0], sizes = [28, 32], strides = [1, 1]} : vector<32x32xf32> to vector<28x32xf32>
    %99 = tpu.concatenate %97, %98 in 0 : vector<4x32xf32>, vector<28x32xf32> -> vector<32x32xf32>
    %c4_i32 = arith.constant 4 : i32
    %100 = vector.broadcast %c4_i32 : i32 to vector<32x1xi32>
    %101 = arith.cmpi sge, %17, %100 : vector<32x1xi32>
    %cst_46 = arith.constant 0.000000e+00 : f32
    %102 = vector.broadcast %cst_46 : f32 to vector<32x32xf32>
    %103 = vector.shape_cast %101 : vector<32x1xi1> to vector<32x1xi1>
    %104 = vector.broadcast %103 : vector<32x1xi1> to vector<32x32xi1>
    %105 = arith.select %104, %99, %102 : vector<32x32xi1>, vector<32x32xf32>
    %106 = tpu.concatenate %105, %96 in 1 : vector<32x32xf32>, vector<32x32xf32> -> vector<32x64xf32>
    %c0_47 = arith.constant 0 : index
    %c0_48 = arith.constant 0 : index
    %107 = vector.load %arg11[%c0_47, %c0_48] : memref<64x32xf32, #tpu.memory_space<vmem>>, vector<64x32xf32>
    %cst_49 = arith.constant dense<0.000000e+00> : vector<32x32xf32>
    %108 = tpu.matmul %106, %107, %cst_49 {dimension_numbers = #tpu.dot_dimension_numbers<[1], [0], [0], [1], [0, 0, 1, 1], [], []>} : vector<32x64xf32>, vector<64x32xf32>, vector<32x32xf32> -> vector<32x32xf32>
    %c0_50 = arith.constant 0 : index
    %c0_51 = arith.constant 0 : index
    %109 = vector.load %arg12[%c0_50, %c0_51] : memref<1x32xf32, #tpu.memory_space<vmem>>, vector<1x32xf32>
    %110 = vector.broadcast %109 : vector<1x32xf32> to vector<32x32xf32>
    %111 = arith.addf %108, %110 : vector<32x32xf32>
    %cst_52 = arith.constant 0.000000e+00 : f32
    %112 = vector.broadcast %cst_52 : f32 to vector<32x32xf32>
    %113 = arith.maximumf %111, %112 : vector<32x32xf32>
    %cst_53 = arith.constant 0.000000e+00 : f32
    %114 = vector.broadcast %cst_53 : f32 to vector<4x32xf32>
    %115 = vector.extract_strided_slice %113 {offsets = [0, 0], sizes = [28, 32], strides = [1, 1]} : vector<32x32xf32> to vector<28x32xf32>
    %116 = tpu.concatenate %114, %115 in 0 : vector<4x32xf32>, vector<28x32xf32> -> vector<32x32xf32>
    %c4_i32_54 = arith.constant 4 : i32
    %117 = vector.broadcast %c4_i32_54 : i32 to vector<32x1xi32>
    %118 = arith.cmpi sge, %17, %117 : vector<32x1xi32>
    %cst_55 = arith.constant 0.000000e+00 : f32
    %119 = vector.broadcast %cst_55 : f32 to vector<32x32xf32>
    %120 = vector.shape_cast %118 : vector<32x1xi1> to vector<32x1xi1>
    %121 = vector.broadcast %120 : vector<32x1xi1> to vector<32x32xi1>
    %122 = arith.select %121, %116, %119 : vector<32x32xi1>, vector<32x32xf32>
    %123 = tpu.concatenate %122, %113 in 1 : vector<32x32xf32>, vector<32x32xf32> -> vector<32x64xf32>
    %c0_56 = arith.constant 0 : index
    %c0_57 = arith.constant 0 : index
    %124 = vector.load %arg13[%c0_56, %c0_57] : memref<64x32xf32, #tpu.memory_space<vmem>>, vector<64x32xf32>
    %cst_58 = arith.constant dense<0.000000e+00> : vector<32x32xf32>
    %125 = tpu.matmul %123, %124, %cst_58 {dimension_numbers = #tpu.dot_dimension_numbers<[1], [0], [0], [1], [0, 0, 1, 1], [], []>} : vector<32x64xf32>, vector<64x32xf32>, vector<32x32xf32> -> vector<32x32xf32>
    %c0_59 = arith.constant 0 : index
    %c0_60 = arith.constant 0 : index
    %126 = vector.load %arg14[%c0_59, %c0_60] : memref<1x32xf32, #tpu.memory_space<vmem>>, vector<1x32xf32>
    %127 = vector.broadcast %126 : vector<1x32xf32> to vector<32x32xf32>
    %128 = arith.addf %125, %127 : vector<32x32xf32>
    %cst_61 = arith.constant 0.000000e+00 : f32
    %129 = vector.broadcast %cst_61 : f32 to vector<32x32xf32>
    %130 = arith.maximumf %128, %129 : vector<32x32xf32>
    %131 = arith.addf %130, %96 : vector<32x32xf32>
    %cst_62 = arith.constant 0.000000e+00 : f32
    %132 = vector.broadcast %cst_62 : f32 to vector<32x32xf32>
    %133 = arith.maximumf %131, %132 : vector<32x32xf32>
    %cst_63 = arith.constant 0.000000e+00 : f32
    %134 = vector.broadcast %cst_63 : f32 to vector<8x32xf32>
    %135 = vector.extract_strided_slice %133 {offsets = [0, 0], sizes = [24, 32], strides = [1, 1]} : vector<32x32xf32> to vector<24x32xf32>
    %136 = tpu.concatenate %134, %135 in 0 : vector<8x32xf32>, vector<24x32xf32> -> vector<32x32xf32>
    %c8_i32 = arith.constant 8 : i32
    %137 = vector.broadcast %c8_i32 : i32 to vector<32x1xi32>
    %138 = arith.cmpi sge, %17, %137 : vector<32x1xi32>
    %cst_64 = arith.constant 0.000000e+00 : f32
    %139 = vector.broadcast %cst_64 : f32 to vector<32x32xf32>
    %140 = vector.shape_cast %138 : vector<32x1xi1> to vector<32x1xi1>
    %141 = vector.broadcast %140 : vector<32x1xi1> to vector<32x32xi1>
    %142 = arith.select %141, %136, %139 : vector<32x32xi1>, vector<32x32xf32>
    %143 = tpu.concatenate %142, %133 in 1 : vector<32x32xf32>, vector<32x32xf32> -> vector<32x64xf32>
    %c0_65 = arith.constant 0 : index
    %c0_66 = arith.constant 0 : index
    %144 = vector.load %arg15[%c0_65, %c0_66] : memref<64x32xf32, #tpu.memory_space<vmem>>, vector<64x32xf32>
    %cst_67 = arith.constant dense<0.000000e+00> : vector<32x32xf32>
    %145 = tpu.matmul %143, %144, %cst_67 {dimension_numbers = #tpu.dot_dimension_numbers<[1], [0], [0], [1], [0, 0, 1, 1], [], []>} : vector<32x64xf32>, vector<64x32xf32>, vector<32x32xf32> -> vector<32x32xf32>
    %c0_68 = arith.constant 0 : index
    %c0_69 = arith.constant 0 : index
    %146 = vector.load %arg16[%c0_68, %c0_69] : memref<1x32xf32, #tpu.memory_space<vmem>>, vector<1x32xf32>
    %147 = vector.broadcast %146 : vector<1x32xf32> to vector<32x32xf32>
    %148 = arith.addf %145, %147 : vector<32x32xf32>
    %cst_70 = arith.constant 0.000000e+00 : f32
    %149 = vector.broadcast %cst_70 : f32 to vector<32x32xf32>
    %150 = arith.maximumf %148, %149 : vector<32x32xf32>
    %cst_71 = arith.constant 0.000000e+00 : f32
    %151 = vector.broadcast %cst_71 : f32 to vector<8x32xf32>
    %152 = vector.extract_strided_slice %150 {offsets = [0, 0], sizes = [24, 32], strides = [1, 1]} : vector<32x32xf32> to vector<24x32xf32>
    %153 = tpu.concatenate %151, %152 in 0 : vector<8x32xf32>, vector<24x32xf32> -> vector<32x32xf32>
    %c8_i32_72 = arith.constant 8 : i32
    %154 = vector.broadcast %c8_i32_72 : i32 to vector<32x1xi32>
    %155 = arith.cmpi sge, %17, %154 : vector<32x1xi32>
    %cst_73 = arith.constant 0.000000e+00 : f32
    %156 = vector.broadcast %cst_73 : f32 to vector<32x32xf32>
    %157 = vector.shape_cast %155 : vector<32x1xi1> to vector<32x1xi1>
    %158 = vector.broadcast %157 : vector<32x1xi1> to vector<32x32xi1>
    %159 = arith.select %158, %153, %156 : vector<32x32xi1>, vector<32x32xf32>
    %160 = tpu.concatenate %159, %150 in 1 : vector<32x32xf32>, vector<32x32xf32> -> vector<32x64xf32>
    %c0_74 = arith.constant 0 : index
    %c0_75 = arith.constant 0 : index
    %161 = vector.load %arg17[%c0_74, %c0_75] : memref<64x32xf32, #tpu.memory_space<vmem>>, vector<64x32xf32>
    %cst_76 = arith.constant dense<0.000000e+00> : vector<32x32xf32>
    %162 = tpu.matmul %160, %161, %cst_76 {dimension_numbers = #tpu.dot_dimension_numbers<[1], [0], [0], [1], [0, 0, 1, 1], [], []>} : vector<32x64xf32>, vector<64x32xf32>, vector<32x32xf32> -> vector<32x32xf32>
    %c0_77 = arith.constant 0 : index
    %c0_78 = arith.constant 0 : index
    %163 = vector.load %arg18[%c0_77, %c0_78] : memref<1x32xf32, #tpu.memory_space<vmem>>, vector<1x32xf32>
    %164 = vector.broadcast %163 : vector<1x32xf32> to vector<32x32xf32>
    %165 = arith.addf %162, %164 : vector<32x32xf32>
    %cst_79 = arith.constant 0.000000e+00 : f32
    %166 = vector.broadcast %cst_79 : f32 to vector<32x32xf32>
    %167 = arith.maximumf %165, %166 : vector<32x32xf32>
    %168 = arith.addf %167, %133 : vector<32x32xf32>
    %cst_80 = arith.constant 0.000000e+00 : f32
    %169 = vector.broadcast %cst_80 : f32 to vector<32x32xf32>
    %170 = arith.maximumf %168, %169 : vector<32x32xf32>
    %c0_81 = arith.constant 0 : index
    %c0_82 = arith.constant 0 : index
    %171 = vector.load %arg19[%c0_81, %c0_82] : memref<32x2xf32, #tpu.memory_space<vmem>>, vector<32x2xf32>
    %cst_83 = arith.constant dense<0.000000e+00> : vector<32x2xf32>
    %172 = tpu.matmul %170, %171, %cst_83 {dimension_numbers = #tpu.dot_dimension_numbers<[1], [0], [0], [1], [0, 0, 1, 1], [], []>} : vector<32x32xf32>, vector<32x2xf32>, vector<32x2xf32> -> vector<32x2xf32>
    %c0_84 = arith.constant 0 : index
    %c0_85 = arith.constant 0 : index
    %173 = vector.load %arg20[%c0_84, %c0_85] : memref<1x2xf32, #tpu.memory_space<vmem>>, vector<1x2xf32>
    %174 = vector.broadcast %173 : vector<1x2xf32> to vector<32x2xf32>
    %175 = arith.addf %172, %174 : vector<32x2xf32>
    %c0_86 = arith.constant 0 : index
    %c0_87 = arith.constant 0 : index
    %176 = vector.load %arg21[%c0_86, %c0_87] : memref<32x2xf32, #tpu.memory_space<vmem>>, vector<32x2xf32>
    %cst_88 = arith.constant dense<0.000000e+00> : vector<32x2xf32>
    %177 = tpu.matmul %170, %176, %cst_88 {dimension_numbers = #tpu.dot_dimension_numbers<[1], [0], [0], [1], [0, 0, 1, 1], [], []>} : vector<32x32xf32>, vector<32x2xf32>, vector<32x2xf32> -> vector<32x2xf32>
    %c0_89 = arith.constant 0 : index
    %c0_90 = arith.constant 0 : index
    %178 = vector.load %arg22[%c0_89, %c0_90] : memref<1x2xf32, #tpu.memory_space<vmem>>, vector<1x2xf32>
    %179 = vector.broadcast %178 : vector<1x2xf32> to vector<32x2xf32>
    %180 = arith.addf %177, %179 : vector<32x2xf32>
    %cst_91 = arith.constant 0.000000e+00 : f32
    %181 = vector.broadcast %cst_91 : f32 to vector<32x2xf32>
    %182 = arith.maximumf %180, %181 : vector<32x2xf32>
    %183 = vector.broadcast %cst_91 : f32 to vector<32x2xf32>
    %184 = arith.subf %180, %183 : vector<32x2xf32>
    %185 = arith.cmpf one, %184, %184 : vector<32x2xf32>
    %186 = vector.broadcast %cst_91 : f32 to vector<32x2xf32>
    %187 = arith.addf %180, %186 : vector<32x2xf32>
    %188 = math.absf %184 : vector<32x2xf32>
    %cst_92 = arith.constant 0.000000e+00 : f32
    %189 = vector.broadcast %cst_92 : f32 to vector<32x2xf32>
    %190 = arith.subf %189, %188 : vector<32x2xf32>
    %191 = math.exp %190 : vector<32x2xf32>
    %192 = math.log1p %191 : vector<32x2xf32>
    %193 = arith.addf %182, %192 : vector<32x2xf32>
    %194 = arith.select %185, %187, %193 : vector<32x2xi1>, vector<32x2xf32>
    %cst_93 = arith.constant 9.900000e-01 : f32
    %195 = vector.broadcast %cst_93 : f32 to vector<32x2xf32>
    %196 = arith.mulf %195, %194 : vector<32x2xf32>
    %cst_94 = arith.constant 0.00999999977 : f32
    %197 = vector.broadcast %cst_94 : f32 to vector<32x2xf32>
    %198 = arith.addf %197, %196 : vector<32x2xf32>
    %199 = tpu.concatenate %175, %198 in 1 : vector<32x2xf32>, vector<32x2xf32> -> vector<32x4xf32>
    %c0_95 = arith.constant 0 : index
    %c0_96 = arith.constant 0 : index
    %200 = vector.load %arg23[%c0_95, %c0_96] : memref<32x4xf32, #tpu.memory_space<vmem>>, vector<32x4xf32>
    tpu.vector_store %arg23[%c0_95, %c0_96], %199 {strides = array<i32>} : memref<32x4xf32, #tpu.memory_space<vmem>>, vector<32x4xf32>,
    return
  }
}

</mosaic_0001>

<bundles_post_ra>
// kernel: tcn_seq_forward.1
= control target key start
LH: loop header
LB: loop body
LE: loop exit
PB: predicated region body
PF: predicated region fallthrough
CT: control target
= control target key end

     0   :  { %vm203_vm0 = vcmask 1041408   ;;  %vm2344_vm1 = vmmov 1   ;;  %v78_v7 = vlaneseq  ;;  %vm135_vm3 = vcmask 1040384   ;;  %s3009_s0 = inlined_call_operand.vmem [shape: f32[32,5], index: 0, kind: input, shape index: {}]   ;;  %s3010_s1 = inlined_call_operand.vmem [shape: f32[10,32], index: 1, kind: input, shape index: {}]   ;;  %s3011_s3 = inlined_call_operand.vmem [shape: f32[64,32], index: 3, kind: input, shape index: {}]   ;;  %s3012_s5 = inlined_call_operand.vmem [shape: f32[5,32], index: 5, kind: input, shape index: {}]   ;;  %s3013_s2 = inlined_call_operand.vmem [shape: f32[1,32], index: 2, kind: input, shape index: {}]   ;;  %s3014_s7 = inlined_call_operand.vmem [shape: f32[64,32], index: 7, kind: input, shape index: {}]   ;;  %s3015_s4 = inlined_call_operand.vmem [shape: f32[1,32], index: 4, kind: input, shape index: {}]   ;;  %s3016_s6 = inlined_call_operand.vmem [shape: f32[1,32], index: 6, kind: input, shape index: {}]   ;;  %s3017_s9 = inlined_call_operand.vmem [shape: f32[64,32], index: 9, kind: input, shape index: {}]   ;;  %s3018_s8 = inlined_call_operand.vmem [shape: f32[1,32], index: 8, kind: input, shape index: {}]   ;;  %s3019_s11 = inlined_call_operand.vmem [shape: f32[64,32], index: 11, kind: input, shape index: {}]   ;;  %s3020_s10 = inlined_call_operand.vmem [shape: f32[1,32], index: 10, kind: input, shape index: {}]   ;;  %s3021_s13 = inlined_call_operand.vmem [shape: f32[64,32], index: 13, kind: input, shape index: {}]   ;;  %s3022_s12 = inlined_call_operand.vmem [shape: f32[1,32], index: 12, kind: input, shape index: {}]   ;;  %s3023_s15 = inlined_call_operand.vmem [shape: f32[64,32], index: 15, kind: input, shape index: {}]   ;;  %s3024_s14 = inlined_call_operand.vmem [shape: f32[1,32], index: 14, kind: input, shape index: {}]   ;;  %s3025_s17 = inlined_call_operand.vmem [shape: f32[64,32], index: 17, kind: input, shape index: {}]   ;;  %s3026_s16 = inlined_call_operand.vmem [shape: f32[1,32], index: 16, kind: input, shape index: {}]   ;;  %s3027_s21 = inlined_call_operand.vmem [shape: f32[32,2], index: 21, kind: input, shape index: {}]   ;;  %s3028_s19 = inlined_call_operand.vmem [shape: f32[32,2], index: 19, kind: input, shape index: {}]   ;;  %s3029_s18 = inlined_call_operand.vmem [shape: f32[1,32], index: 18, kind: input, shape index: {}]   ;;  %s3030_s22 = inlined_call_operand.vmem [shape: f32[1,2], index: 22, kind: input, shape index: {}]   ;;  %s3031_s20 = inlined_call_operand.vmem [shape: f32[1,2], index: 20, kind: input, shape index: {}]   ;;  %s3032_s23 = inlined_call_operand.vmem [shape: f32[32,4], index: 23, kind: output, shape index: {}]  }
   0x1   :  { %3037 = sst [smem:[#allocation2_spill]] %s3009_s0  ;;  %vm2190_vm2 = vmpackc.low %vm203_vm0, %vm2344_vm1  ;;  %vm176_vm5 = vcmask 39936   ;;  %vm190_vm7 = vcmask 80896   ;;  %vm466_vm8 = vcmask 1044480   ;;  %vm328_vm9 = vcmask 261120  }
   0x2   :  { %3038 = sst [smem:[#allocation3_spill]] %s3010_s1  ;;  %s3045_s24 = sld [smem:[#allocation2_spill]]  ;;  %v79_v8 = vshrl.u32 %v78_v7, 7  ;;  %vm348_vm10 = vcmask 523264   ;;  %vm891_vm13 = vcmask 1043456  }
   0x3   :  { %3039 = sst [smem:[#allocation4_spill]] %s3011_s3  ;;  %s2343_s1 = smov 5  }
   0x4   :  { %3040 = sst [smem:[#allocation5_spill]] %s3012_s5  ;;  %v81_v9 = vadd.s32 16, %v79_v8  ;;  %v2492_v11 = vand.u32 15, %v79_v8 }
   0x5   :  { %3041 = sst [smem:[#allocation6_spill]] %s3013_s2  ;;  %s3048_s2 = sld [smem:[#allocation5_spill]] }
   0x6   :  { %3042 = sst [smem:[#allocation7_spill]] %s3014_s7  ;;  %v2495_v14 = vand.u32 15, %v81_v9  ;;  %vm148_vm4 = vcmp.ge.s32.totalorder %v2492_v11, 1  ;;  %vm579_vm11 = vcmp.ge.s32.totalorder %v2492_v11, 2  ;;  %vm904_vm14 = vcmp.ge.s32.totalorder %v2492_v11, 4  ;;  %v1244_v11 = vld [vmem:[%s3023_s15] sm:$0xff] }
   0x7   :  { %3043 = sst [smem:[#allocation8_spill]] %s3015_s4  ;;  %s3046_s4 = sld [smem:[#allocation3_spill]] }
   0x8   :  { %3044 = sst [smem:[#allocation9_spill]] %s3016_s6  ;;  %v74_v0 = vld [vmem:[%s3045_s24] sm:$0xff]  ;;  %v2473_v1 = vld [vmem:[%s3045_s24 + $0x10] sm:$0xff]  ;;  %v75_v3 = vld [vmem:[%s3045_s24 + $0x8] sm:$0xff]  ;;  %vm150_vm6 = vcmp.ge.s32.totalorder %v2495_v14, 1  ;;  %s3050_s28 = sld [smem:[#allocation7_spill]] }
   0x9   :  { %164 = vrot.lane.b32.xlu0 %v74_v0, %s2343_s1  ;;  %168 = vrot.lane.b32.xlu1 %v2473_v1, %s2343_s1  ;;  %v2485_v4 = vld [vmem:[%s3045_s24 + $0x18] sm:$0xff]  ;;  %v136_v10 = vrot.slane %v74_v0, 7  ;;  %v139_v12 = vrot.slane %v2473_v1, 7  ;;  %v137_v13 = vrot.slane %v75_v3, 7  ;;  %s3047_s24 = sld [smem:[#allocation4_spill]]  ;;  %s3052_s7 = sld [smem:[#allocation9_spill]] }
   0xa   :  { %v141_v18 = vrot.slane %v2485_v4, 7  ;;  %vm581_vm12 = vcmp.ge.s32.totalorder %v2495_v14, 2  ;;  %vm906_vm15 = vcmp.ge.s32.totalorder %v2495_v14, 4  ;;  %v1246_v14 = vld [vmem:[%s3023_s15 + $0x10] sm:$0xff] }
   0xb   :  { %v147_v15 = vsel %vm135_vm3, 0.0, %v136_v10  ;;  %v140_v17 = vsel %vm135_vm3, %v137_v13, %v139_v12  ;;  %v138_v23 = vsel %vm135_vm3, %v136_v10, %v137_v13  ;;  %v450_v38 = vld [vmem:[%s3048_s2] sm:$0x1f]  ;;  %s3051_s2 = sld [smem:[#allocation8_spill]] }
   0xc   :  { %v160_v16 = vsel %vm148_vm4, %v147_v15, 0.0  ;;  %v162_v22 = vsel %vm150_vm6, %v140_v17, 0.0  ;;  %v142_v27 = vsel %vm135_vm3, %v139_v12, %v141_v18 }
   0xd   :  { %v181_v2 = vld [vmem:[%s3046_s4] sm:$0xff]  ;;  %v182_v5 = vld [vmem:[%s3046_s4 + $0x8] sm:$0x3]  ;;  %166 = vrot.lane.b32.xlu0 %v75_v3, %s2343_s1  ;;  %170 = vrot.lane.b32.xlu1 %v2485_v4, %s2343_s1  ;;  %s3049_s4 = sld [smem:[#allocation6_spill]] }
   0xe   :  { %v2189_v6 = vpack.c.bf16 %v182_v5, %v181_v2  ;;  %v612_v17 = vld [vmem:[%s3050_s28 + $0x8] sm:$0xff]  ;;  %v613_v18 = vld [vmem:[%s3050_s28 + $0x10] sm:$0xff] }
   0xf   :  { %v333_v30 = vld [vmem:[%s3047_s24] sm:$0xff]  ;;  %v334_v31 = vld [vmem:[%s3047_s24 + $0x8] sm:$0xff]  ;;  %v335_v32 = vld [vmem:[%s3047_s24 + $0x10] sm:$0xff] }
  0x10   :  { %2191 = vmatprep.subr.msk.bf16.mxu0 %vm2190_vm2, %v2189_v6  ;;  %v2195_v33 = vpack.c.bf16 %v334_v31, %v333_v30  ;;  %v336_v34 = vld [vmem:[%s3047_s24 + $0x18] sm:$0xff]  ;;  %v337_v36 = vld [vmem:[%s3047_s24 + $0x20] sm:$0xff]  ;;  %v338_v37 = vld [vmem:[%s3047_s24 + $0x28] sm:$0xff] }
  0x11   :  { %2194 = vmatpush3.bf16.msk.msra.mxu0 %vm2190_vm2, %v2189_v6  ;;  %v2199_v35 = vpack.c.bf16 %v336_v34, %v335_v32  ;;  %v2203_v39 = vpack.c.bf16 %v338_v37, %v337_v36  ;;  %v339_v40 = vld [vmem:[%s3047_s24 + $0x30] sm:$0xff]  ;;  %v340_v41 = vld [vmem:[%s3047_s24 + $0x38] sm:$0xff]  ;;  %s2345_s24 = smov 32  }
  0x12   :  { %2196 = vmatprep.subr.bf16.mxu1 %v2195_v33  ;;  %2021 = vmatprep.subr.msk.mxu0 %vm466_vm8, %v450_v38  ;;  %v2207_v42 = vpack.c.bf16 %v340_v41, %v339_v40 }
  0x13   :  { %2198 = vmatpush3.bf16.msra.mxu1 %v2195_v33  ;;  %v1821_v43 = vld [vmem:[%s3049_s4] ss:$0 sm:$0xff] }
  0x14   :  { %2200 = vmatprep.subr.bf16.mxu1 %v2199_v35 }
  0x17   :  { %2202 = vmatpush3.bf16.msra.mxu1 %v2199_v35 }
  0x18   :  { %2204 = vmatprep.subr.bf16.mxu1 %v2203_v39 }
  0x1b   :  { %2206 = vmatpush3.bf16.msra.mxu1 %v2203_v39 }
  0x1c   :  { %2208 = vmatprep.subr.bf16.mxu1 %v2207_v42 }
  0x1f   :  { %2210 = vmatpush3.bf16.msra.mxu1 %v2207_v42 }
  0x7b   :  { %v165_v19 = vpop.permute.xlu0 %164  ;;  %v169_v20 = vpop.permute.xlu1 %168 }
  0x7c   :  { %v177_v21 = vsel %vm176_vm5, %v160_v16, %v165_v19  ;;  %v179_v24 = vsel %vm176_vm5, %v162_v22, %v169_v20  ;;  %v611_v16 = vld [vmem:[%s3050_s28] sm:$0xff]  ;;  %v614_v20 = vld [vmem:[%s3050_s28 + $0x18] sm:$0xff] }
  0x7d   :  { %1993 = vmatprep.mubr.msk.f32.mxu0 %vm190_vm7, %v177_v21  ;;  %v2211_v19 = vpack.c.bf16 %v612_v17, %v611_v16  ;;  %v2215_v21 = vpack.c.bf16 %v614_v20, %v613_v18  ;;  %v615_v22 = vld [vmem:[%s3050_s28 + $0x20] sm:$0xff]  ;;  %v768_v17 = vld [vmem:[%s3017_s9 + $0x28] sm:$0xff]  ;;  %v770_v20 = vld [vmem:[%s3017_s9 + $0x38] sm:$0xff] }
  0x7e   :  { %v767_v16 = vld [vmem:[%s3017_s9 + $0x20] sm:$0xff] }
  0x7f   :  { %v167_v25 = vpop.permute.xlu0 %166  ;;  %v171_v26 = vpop.permute.xlu1 %170  ;;  %v2235_v18 = vpack.c.bf16 %v768_v17, %v767_v16 }
  0x80   :  { %v178_v28 = vsel %vm176_vm5, %v138_v23, %v167_v25  ;;  %v180_v29 = vsel %vm176_vm5, %v142_v27, %v171_v26  ;;  %v616_v23 = vld [vmem:[%s3050_s28 + $0x28] sm:$0xff]  ;;  %v617_v25 = vld [vmem:[%s3050_s28 + $0x30] sm:$0xff]  ;;  %v618_v26 = vld [vmem:[%s3050_s28 + $0x38] sm:$0xff] }
  0x81   :  { %1994 = vmatmul.mubr.msk.f32.vlgmr.msra.gmra.mrb[0].mxu0 %vm190_vm7, %v178_v28  ;;  %v2223_v27 = vpack.c.bf16 %v618_v26, %v617_v25  ;;  %v1827_v28 = vld [vmem:[%s3051_s2] ss:$0 sm:$0xff] }
  0x82   :  { %1996 = vmatprep.mubr.msk.f32.mxu0 %vm190_vm7, %v179_v24  ;;  %2022 = vmatpush3.msk.msra.mxu0 %vm466_vm8, %v450_v38  ;;  %v2219_v24 = vpack.c.bf16 %v616_v23, %v615_v22  ;;  %v1838_v22 = vld [vmem:[%s3018_s8] ss:$0 sm:$0xff]  ;;  %vm1807_vm8 = vcmask 15360  }
  0x83   :  { %2212 = vmatprep.subr.bf16.mxu0 %v2211_v19 }
  0x85   :  { %1997 = vmatmul.mubr.msk.f32.gmra.mrb[2].mxu0 %vm190_vm7, %v180_v29  ;;  %v1832_v29 = vld [vmem:[%s3052_s7] ss:$0 sm:$0xff] }
  0x86   :  { %2023 = vmatprep.mubr.msk.f32.mxu0 %vm176_vm5, %v74_v0 }
  0x89   :  { %2024 = vmatmul.mubr.msk.f32.vlgmr.msra.gmra.mrb[4].mxu0 %vm176_vm5, %v75_v3 }
  0x8a   :  { %2026 = vmatprep.mubr.msk.f32.mxu0 %vm176_vm5, %v2473_v1  ;;  %2214 = vmatpush3.bf16.msra.mxu0 %v2211_v19  ;;  %v769_v19 = vld [vmem:[%s3017_s9 + $0x30] sm:$0xff] }
  0x8b   :  { %2216 = vmatprep.subr.bf16.mxu0 %v2215_v21 }
  0x8d   :  { %2027 = vmatmul.mubr.msk.f32.gmra.mrb[6].mxu0 %vm176_vm5, %v2485_v4 }
  0x8e   :  { %2218 = vmatpush3.bf16.msra.mxu0 %v2215_v21  ;;  %v2239_v21 = vpack.c.bf16 %v770_v20, %v769_v19 }
  0x8f   :  { %2220 = vmatprep.subr.bf16.mxu0 %v2219_v24 }
  0x92   :  { %2222 = vmatpush3.bf16.msra.mxu0 %v2219_v24 }
  0x93   :  { %2224 = vmatprep.subr.bf16.mxu0 %v2223_v27 }
  0x96   :  { %2226 = vmatpush3.bf16.msra.mxu0 %v2223_v27 }
 0x154   :  { %v1995_v44 = vpop.f32.mrb[0].mxu0 }
 0x155   :  { %v279_v45 = vadd.f32 %v1995_v44, %v1821_v43  ;;  %v273_v46 = vpop.f32.mrb[1].mxu0 }
 0x156   :  { %v274_v47 = vadd.f32 %v1821_v43, %v273_v46 }
 0x157   :  { %v293_v48 = vmax.f32 %v279_v45, 0.0 }
 0x158   :  { %v292_v49 = vmax.f32 %v274_v47, 0.0  ;;  %v1998_v50 = vpop.f32.mrb[2].mxu0 }
 0x159   :  { %v301_v51 = vrot.slane %v293_v48, 7  ;;  %v289_v52 = vadd.f32 %v1998_v50, %v1821_v43  ;;  %318 = vrot.lane.b32.xlu1 %v293_v48, %s2345_s24  ;;  %v283_v53 = vpop.f32.mrb[3].mxu0 }
 0x15a   :  { %v300_v54 = vrot.slane %v292_v49, 7  ;;  %v284_v55 = vadd.f32 %v1821_v43, %v283_v53  ;;  %316 = vrot.lane.b32.xlu0 %v292_v49, %s2345_s24 }
 0x15b   :  { %v295_v56 = vmax.f32 %v289_v52, 0.0 }
 0x15c   :  { %v294_v57 = vmax.f32 %v284_v55, 0.0  ;;  %v302_v58 = vsel %vm135_vm3, %v300_v54, %v301_v51  ;;  %v311_v63 = vsel %vm135_vm3, 0.0, %v300_v54  ;;  %v2025_v10 = vpop.f32.mrb[4].mxu0 }
 0x15d   :  { %v305_v59 = vrot.slane %v295_v56, 7  ;;  %322 = vrot.lane.b32.xlu1 %v295_v56, %s2345_s24  ;;  %v312_v2 = vsel %vm148_vm4, %v311_v63, 0.0  ;;  %v536_v12 = vpop.f32.mrb[5].mxu0  ;;  %v542_v33 = vadd.f32 %v2025_v10, %v1832_v29  ;;  %v765_v10 = vld [vmem:[%s3017_s9 + $0x10] sm:$0xff] }
 0x15e   :  { %v303_v60 = vrot.slane %v294_v57, 7  ;;  %320 = vrot.lane.b32.xlu0 %v294_v57, %s2345_s24  ;;  %v537_v35 = vadd.f32 %v1832_v29, %v536_v12 }
 0x160   :  { %v306_v61 = vsel %vm135_vm3, %v303_v60, %v305_v59  ;;  %v304_v62 = vsel %vm135_vm3, %v301_v51, %v303_v60  ;;  %v2028_v13 = vpop.f32.mrb[6].mxu0 }
 0x161   :  { %v314_v6 = vsel %vm150_vm6, %v304_v62, 0.0  ;;  %v546_v15 = vpop.f32.mrb[7].mxu0  ;;  %v552_v42 = vadd.f32 %v2028_v13, %v1832_v29  ;;  %v766_v13 = vld [vmem:[%s3017_s9 + $0x18] sm:$0xff] }
 0x162   :  { %v547_v45 = vadd.f32 %v1832_v29, %v546_v15  ;;  %v2231_v15 = vpack.c.bf16 %v766_v13, %v765_v10 }
 0x1cb   :  { %v319_v0 = vpop.permute.xlu1 %318 }
 0x1cc   :  { %v317_v1 = vpop.permute.xlu0 %316  ;;  %v330_v4 = vsel %vm328_vm9, %v302_v58, %v319_v0 }
 0x1cd   :  { %v329_v3 = vsel %vm328_vm9, %v312_v2, %v317_v1 }
 0x1ce   :  { %2015 = vmatprep.mubr.msk.f32.mxu1 %vm348_vm10, %v329_v3 }
 0x1cf   :  { %v323_v5 = vpop.permute.xlu1 %322  ;;  %2016 = vmatmul.mubr.msk.f32.vlgmr.msra.gmra.mrb[0].mxu1 %vm348_vm10, %v330_v4 }
 0x1d0   :  { %v321_v7 = vpop.permute.xlu0 %320  ;;  %v332_v9 = vsel %vm328_vm9, %v306_v61, %v323_v5 }
 0x1d1   :  { %v331_v8 = vsel %vm328_vm9, %v314_v6, %v321_v7 }
 0x1d2   :  { %2018 = vmatprep.mubr.msk.f32.mxu1 %vm348_vm10, %v331_v8  ;;  %v763_v8 = vld [vmem:[%s3017_s9] sm:$0xff] }
 0x1d3   :  { %2019 = vmatmul.mubr.msk.f32.gmra.mrb[2].mxu1 %vm348_vm10, %v332_v9  ;;  %v764_v9 = vld [vmem:[%s3017_s9 + $0x8] sm:$0xff] }
 0x1d4   :  { %v2227_v12 = vpack.c.bf16 %v764_v9, %v763_v8 }
 0x1d6   :  { %2228 = vmatprep.subr.bf16.mxu1 %v2227_v12 }
 0x1d7   :  { %2230 = vmatpush3.bf16.msra.mxu1 %v2227_v12 }
 0x1d8   :  { %2232 = vmatprep.subr.bf16.mxu1 %v2231_v15 }
 0x1db   :  { %2234 = vmatpush3.bf16.msra.mxu1 %v2231_v15 }
 0x1dc   :  { %2236 = vmatprep.subr.bf16.mxu1 %v2235_v18 }
 0x1df   :  { %2238 = vmatpush3.bf16.msra.mxu1 %v2235_v18 }
 0x1e0   :  { %2240 = vmatprep.subr.bf16.mxu1 %v2239_v21 }
 0x1e3   :  { %2242 = vmatpush3.bf16.msra.mxu1 %v2239_v21 }
 0x2a2   :  { %v2017_v30 = vpop.f32.mrb[0].mxu1 }
 0x2a3   :  { %v433_v31 = vadd.f32 %v2017_v30, %v1827_v28  ;;  %v427_v32 = vpop.f32.mrb[1].mxu1 }
 0x2a4   :  { %v428_v34 = vadd.f32 %v1827_v28, %v427_v32 }
 0x2a5   :  { %v447_v36 = vmax.f32 %v433_v31, 0.0 }
 0x2a6   :  { %v446_v37 = vmax.f32 %v428_v34, 0.0  ;;  %v2020_v38 = vpop.f32.mrb[2].mxu1 }
 0x2a7   :  { %v556_v39 = vadd.f32 %v542_v33, %v447_v36  ;;  %v443_v40 = vadd.f32 %v2020_v38, %v1827_v28  ;;  %v437_v41 = vpop.f32.mrb[3].mxu1 }
 0x2a8   :  { %v555_v43 = vadd.f32 %v537_v35, %v446_v37  ;;  %v438_v44 = vadd.f32 %v1827_v28, %v437_v41 }
 0x2a9   :  { %v2602_v46 = vmax.f32 %v556_v39, 0.0  ;;  %v449_v47 = vmax.f32 %v443_v40, 0.0 }
 0x2aa   :  { %v2604_v48 = vmax.f32 %v555_v43, 0.0  ;;  %v448_v49 = vmax.f32 %v438_v44, 0.0 }
 0x2ab   :  { %v558_v50 = vadd.f32 %v552_v42, %v449_v47  ;;  %597 = vrot.lane.b32.xlu1 %v2602_v46, %s2345_s24  ;;  %v568_v55 = vrot.slane %v2602_v46, 6 }
 0x2ac   :  { %v557_v51 = vadd.f32 %v547_v45, %v448_v49  ;;  %595 = vrot.lane.b32.xlu0 %v2604_v48, %s2345_s24  ;;  %v567_v54 = vrot.slane %v2604_v48, 6 }
 0x2ad   :  { %v2610_v52 = vmax.f32 %v558_v50, 0.0 }
 0x2ae   :  { %v2612_v53 = vmax.f32 %v557_v51, 0.0  ;;  %v578_v57 = vsel %vm203_vm0, 0.0, %v567_v54  ;;  %v569_v62 = vsel %vm203_vm0, %v567_v54, %v568_v55 }
 0x2af   :  { %601 = vrot.lane.b32.xlu1 %v2610_v52, %s2345_s24  ;;  %v591_v60 = vsel %vm579_vm11, %v578_v57, 0.0  ;;  %v572_v61 = vrot.slane %v2610_v52, 6  ;;  %v936_v57 = vld [vmem:[%s3019_s11] sm:$0xff] }
 0x2b0   :  { %599 = vrot.lane.b32.xlu0 %v2612_v53, %s2345_s24  ;;  %v570_v56 = vrot.slane %v2612_v53, 6 }
 0x2b2   :  { %v571_v0 = vsel %vm203_vm0, %v568_v55, %v570_v56  ;;  %v573_v5 = vsel %vm203_vm0, %v570_v56, %v572_v61  ;;  %v939_v61 = vld [vmem:[%s3019_s11 + $0x18] sm:$0xff] }
 0x2b3   :  { %v593_v3 = vsel %vm581_vm12, %v571_v0, 0.0  ;;  %v941_v0 = vld [vmem:[%s3019_s11 + $0x28] sm:$0xff] }
 0x31d   :  { %v598_v58 = vpop.permute.xlu1 %597 }
 0x31e   :  { %v596_v59 = vpop.permute.xlu0 %595  ;;  %v608_v1 = vsel %vm328_vm9, %v569_v62, %v598_v58  ;;  %v937_v58 = vld [vmem:[%s3019_s11 + $0x8] sm:$0xff] }
 0x31f   :  { %v607_v63 = vsel %vm328_vm9, %v591_v60, %v596_v59  ;;  %v938_v59 = vld [vmem:[%s3019_s11 + $0x10] sm:$0xff]  ;;  %v2243_v60 = vpack.c.bf16 %v937_v58, %v936_v57  ;;  %v1848_v58 = vld [vmem:[%s3022_s12] ss:$0 sm:$0xff] }
 0x320   :  { %2045 = vmatprep.mubr.msk.f32.mxu0 %vm348_vm10, %v607_v63  ;;  %v2247_v62 = vpack.c.bf16 %v939_v61, %v938_v59  ;;  %v940_v63 = vld [vmem:[%s3019_s11 + $0x20] sm:$0xff] }
 0x321   :  { %v602_v2 = vpop.permute.xlu1 %601  ;;  %2046 = vmatmul.mubr.msk.f32.vlgmr.msra.gmra.mrb[8].mxu0 %vm348_vm10, %v608_v1  ;;  %2244 = vmatprep.subr.bf16.mxu0 %v2243_v60  ;;  %v2251_v1 = vpack.c.bf16 %v941_v0, %v940_v63 }
 0x322   :  { %v600_v4 = vpop.permute.xlu0 %599  ;;  %v610_v7 = vsel %vm328_vm9, %v573_v5, %v602_v2  ;;  %2246 = vmatpush3.bf16.msra.mxu0 %v2243_v60  ;;  %v942_v2 = vld [vmem:[%s3019_s11 + $0x30] sm:$0xff]  ;;  %v1843_v5 = vld [vmem:[%s3020_s10] ss:$0 sm:$0xff] }
 0x323   :  { %v609_v6 = vsel %vm328_vm9, %v593_v3, %v600_v4  ;;  %2248 = vmatprep.subr.bf16.mxu0 %v2247_v62  ;;  %v943_v3 = vld [vmem:[%s3019_s11 + $0x38] sm:$0xff] }
 0x324   :  { %2048 = vmatprep.mubr.msk.f32.mxu0 %vm348_vm10, %v609_v6  ;;  %v2255_v4 = vpack.c.bf16 %v943_v3, %v942_v2 }
 0x325   :  { %2049 = vmatmul.mubr.msk.f32.gmra.mrb[10].mxu0 %vm348_vm10, %v610_v7 }
 0x326   :  { %2250 = vmatpush3.bf16.msra.mxu0 %v2247_v62 }
 0x327   :  { %2252 = vmatprep.subr.bf16.mxu0 %v2251_v1 }
 0x32a   :  { %2254 = vmatpush3.bf16.msra.mxu0 %v2251_v1 }
 0x32b   :  { %2256 = vmatprep.subr.bf16.mxu0 %v2255_v4 }
 0x32e   :  { %2258 = vmatpush3.bf16.msra.mxu0 %v2255_v4 }
 0x3f4   :  { %v2047_v23 = vpop.f32.mrb[8].mxu0 }
 0x3f5   :  { %v710_v24 = vadd.f32 %v2047_v23, %v1838_v22  ;;  %v704_v25 = vpop.f32.mrb[9].mxu0 }
 0x3f6   :  { %v705_v26 = vadd.f32 %v1838_v22, %v704_v25 }
 0x3f7   :  { %v724_v27 = vmax.f32 %v710_v24, 0.0 }
 0x3f8   :  { %v723_v28 = vmax.f32 %v705_v26, 0.0  ;;  %v2050_v29 = vpop.f32.mrb[10].mxu0 }
 0x3f9   :  { %v732_v30 = vrot.slane %v724_v27, 6  ;;  %v720_v31 = vadd.f32 %v2050_v29, %v1838_v22  ;;  %749 = vrot.lane.b32.xlu1 %v724_v27, %s2345_s24  ;;  %v714_v32 = vpop.f32.mrb[11].mxu0 }
 0x3fa   :  { %v731_v33 = vrot.slane %v723_v28, 6  ;;  %v715_v34 = vadd.f32 %v1838_v22, %v714_v32  ;;  %747 = vrot.lane.b32.xlu0 %v723_v28, %s2345_s24 }
 0x3fb   :  { %v726_v35 = vmax.f32 %v720_v31, 0.0 }
 0x3fc   :  { %v725_v36 = vmax.f32 %v715_v34, 0.0  ;;  %v733_v37 = vsel %vm203_vm0, %v731_v33, %v732_v30  ;;  %v742_v42 = vsel %vm203_vm0, 0.0, %v731_v33 }
 0x3fd   :  { %v736_v38 = vrot.slane %v726_v35, 6  ;;  %753 = vrot.lane.b32.xlu1 %v726_v35, %s2345_s24  ;;  %v743_v45 = vsel %vm579_vm11, %v742_v42, 0.0  ;;  %v1088_v42 = vld [vmem:[%s3021_s13] sm:$0xff] }
 0x3fe   :  { %v734_v39 = vrot.slane %v725_v36, 6  ;;  %751 = vrot.lane.b32.xlu0 %v725_v36, %s2345_s24 }
 0x400   :  { %v737_v40 = vsel %vm203_vm0, %v734_v39, %v736_v38  ;;  %v735_v41 = vsel %vm203_vm0, %v732_v30, %v734_v39 }
 0x401   :  { %v745_v51 = vsel %vm581_vm12, %v735_v41, 0.0 }
 0x46b   :  { %v750_v43 = vpop.permute.xlu1 %749 }
 0x46c   :  { %v748_v44 = vpop.permute.xlu0 %747  ;;  %v760_v49 = vsel %vm328_vm9, %v733_v37, %v750_v43  ;;  %v1089_v43 = vld [vmem:[%s3021_s13 + $0x8] sm:$0xff] }
 0x46d   :  { %v759_v47 = vsel %vm328_vm9, %v743_v45, %v748_v44  ;;  %v1090_v44 = vld [vmem:[%s3021_s13 + $0x10] sm:$0xff]  ;;  %v2259_v45 = vpack.c.bf16 %v1089_v43, %v1088_v42 }
 0x46e   :  { %2067 = vmatprep.mubr.msk.f32.mxu1 %vm348_vm10, %v759_v47  ;;  %v1091_v47 = vld [vmem:[%s3021_s13 + $0x18] sm:$0xff] }
 0x46f   :  { %v754_v50 = vpop.permute.xlu1 %753  ;;  %2068 = vmatmul.mubr.msk.f32.vlgmr.msra.gmra.mrb[4].mxu1 %vm348_vm10, %v760_v49  ;;  %v2263_v49 = vpack.c.bf16 %v1091_v47, %v1090_v44  ;;  %2260 = vmatprep.subr.bf16.mxu1 %v2259_v45 }
 0x470   :  { %v752_v54 = vpop.permute.xlu0 %751  ;;  %v762_v56 = vsel %vm328_vm9, %v737_v40, %v754_v50  ;;  %v1092_v50 = vld [vmem:[%s3021_s13 + $0x20] sm:$0xff]  ;;  %2262 = vmatpush3.bf16.msra.mxu1 %v2259_v45 }
 0x471   :  { %v761_v55 = vsel %vm328_vm9, %v745_v51, %v752_v54  ;;  %v1093_v51 = vld [vmem:[%s3021_s13 + $0x28] sm:$0xff]  ;;  %2264 = vmatprep.subr.bf16.mxu1 %v2263_v49 }
 0x472   :  { %2070 = vmatprep.mubr.msk.f32.mxu1 %vm348_vm10, %v761_v55  ;;  %v2267_v54 = vpack.c.bf16 %v1093_v51, %v1092_v50  ;;  %v1094_v55 = vld [vmem:[%s3021_s13 + $0x30] sm:$0xff] }
 0x473   :  { %2071 = vmatmul.mubr.msk.f32.gmra.mrb[6].mxu1 %vm348_vm10, %v762_v56  ;;  %v1095_v56 = vld [vmem:[%s3021_s13 + $0x38] sm:$0xff] }
 0x474   :  { %2266 = vmatpush3.bf16.msra.mxu1 %v2263_v49  ;;  %v2271_v57 = vpack.c.bf16 %v1095_v56, %v1094_v55 }
 0x475   :  { %2268 = vmatprep.subr.bf16.mxu1 %v2267_v54 }
 0x478   :  { %2270 = vmatpush3.bf16.msra.mxu1 %v2267_v54 }
 0x479   :  { %2272 = vmatprep.subr.bf16.mxu1 %v2271_v57 }
 0x47c   :  { %2274 = vmatpush3.bf16.msra.mxu1 %v2271_v57 }
 0x542   :  { %v2069_v6 = vpop.f32.mrb[4].mxu1 }
 0x543   :  { %v862_v7 = vadd.f32 %v2069_v6, %v1843_v5  ;;  %v856_v8 = vpop.f32.mrb[5].mxu1 }
 0x544   :  { %v857_v9 = vadd.f32 %v1843_v5, %v856_v8 }
 0x545   :  { %v876_v10 = vmax.f32 %v862_v7, 0.0 }
 0x546   :  { %v875_v12 = vmax.f32 %v857_v9, 0.0  ;;  %v2072_v13 = vpop.f32.mrb[6].mxu1 }
 0x547   :  { %v880_v15 = vadd.f32 %v876_v10, %v2602_v46  ;;  %v872_v16 = vadd.f32 %v2072_v13, %v1843_v5  ;;  %v866_v17 = vpop.f32.mrb[7].mxu1 }
 0x548   :  { %v879_v18 = vadd.f32 %v875_v12, %v2604_v48  ;;  %v867_v19 = vadd.f32 %v1843_v5, %v866_v17 }
 0x549   :  { %v2716_v20 = vmax.f32 %v880_v15, 0.0  ;;  %v878_v21 = vmax.f32 %v872_v16, 0.0 }
 0x54a   :  { %v2718_v22 = vmax.f32 %v879_v18, 0.0  ;;  %v877_v23 = vmax.f32 %v867_v19, 0.0 }
 0x54b   :  { %v882_v24 = vadd.f32 %v878_v21, %v2610_v52  ;;  %922 = vrot.lane.b32.xlu1 %v2716_v20, %s2345_s24  ;;  %v893_v26 = vrot.slane %v2716_v20, 4 }
 0x54c   :  { %v881_v25 = vadd.f32 %v877_v23, %v2612_v53  ;;  %920 = vrot.lane.b32.xlu0 %v2718_v22, %s2345_s24  ;;  %v892_v52 = vrot.slane %v2718_v22, 4 }
 0x54d   :  { %v2726_v46 = vmax.f32 %v882_v24, 0.0 }
 0x54e   :  { %v2728_v48 = vmax.f32 %v881_v25, 0.0  ;;  %v903_v27 = vsel %vm891_vm13, 0.0, %v892_v52  ;;  %v894_v32 = vsel %vm891_vm13, %v892_v52, %v893_v26 }
 0x54f   :  { %926 = vrot.lane.b32.xlu1 %v2726_v46, %s2345_s24  ;;  %v916_v30 = vsel %vm904_vm14, %v903_v27, 0.0  ;;  %v897_v31 = vrot.slane %v2726_v46, 4  ;;  %v1245_v27 = vld [vmem:[%s3023_s15 + $0x8] sm:$0xff] }
 0x550   :  { %924 = vrot.lane.b32.xlu0 %v2728_v48, %s2345_s24  ;;  %v895_v53 = vrot.slane %v2728_v48, 4 }
 0x552   :  { %v896_v34 = vsel %vm891_vm13, %v893_v26, %v895_v53  ;;  %v898_v39 = vsel %vm891_vm13, %v895_v53, %v897_v31  ;;  %v1248_v31 = vld [vmem:[%s3023_s15 + $0x20] sm:$0xff] }
 0x553   :  { %v918_v37 = vsel %vm906_vm15, %v896_v34, 0.0  ;;  %v1250_v34 = vld [vmem:[%s3023_s15 + $0x30] sm:$0xff] }
 0x5bd   :  { %v923_v28 = vpop.permute.xlu1 %922 }
 0x5be   :  { %v921_v29 = vpop.permute.xlu0 %920  ;;  %v933_v35 = vsel %vm328_vm9, %v894_v32, %v923_v28  ;;  %v2275_v28 = vpack.c.bf16 %v1245_v27, %v1244_v11  ;;  %v1249_v32 = vld [vmem:[%s3023_s15 + $0x28] sm:$0xff] }
 0x5bf   :  { %v932_v33 = vsel %vm328_vm9, %v916_v30, %v921_v29  ;;  %v1247_v29 = vld [vmem:[%s3023_s15 + $0x18] sm:$0xff] }
 0x5c0   :  { %2089 = vmatprep.mubr.msk.f32.mxu0 %vm348_vm10, %v932_v33  ;;  %v2279_v30 = vpack.c.bf16 %v1247_v29, %v1246_v14  ;;  %2276 = vmatprep.subr.bf16.mxu0 %v2275_v28  ;;  %v2283_v33 = vpack.c.bf16 %v1249_v32, %v1248_v31 }
 0x5c1   :  { %v927_v36 = vpop.permute.xlu1 %926  ;;  %2090 = vmatmul.mubr.msk.f32.vlgmr.msra.gmra.mrb[12].mxu0 %vm348_vm10, %v933_v35  ;;  %v1251_v35 = vld [vmem:[%s3023_s15 + $0x38] sm:$0xff] }
 0x5c2   :  { %v925_v38 = vpop.permute.xlu0 %924  ;;  %v935_v41 = vsel %vm328_vm9, %v898_v39, %v927_v36  ;;  %2278 = vmatpush3.bf16.msra.mxu0 %v2275_v28  ;;  %v2287_v36 = vpack.c.bf16 %v1251_v35, %v1250_v34  ;;  %v1615_v35 = vld [vmem:[%s3027_s21] sm:$0xff] }
 0x5c3   :  { %v934_v40 = vsel %vm328_vm9, %v918_v37, %v925_v38  ;;  %2280 = vmatprep.subr.bf16.mxu0 %v2279_v30  ;;  %v1853_v37 = vld [vmem:[%s3024_s14] ss:$0 sm:$0xff] }
 0x5c4   :  { %2092 = vmatprep.mubr.msk.f32.mxu0 %vm348_vm10, %v934_v40 }
 0x5c5   :  { %2093 = vmatmul.mubr.msk.f32.gmra.mrb[14].mxu0 %vm348_vm10, %v935_v41 }
 0x5c6   :  { %2282 = vmatpush3.bf16.msra.mxu0 %v2279_v30 }
 0x5c7   :  { %2284 = vmatprep.subr.bf16.mxu0 %v2283_v33 }
 0x5ca   :  { %2286 = vmatpush3.bf16.msra.mxu0 %v2283_v33 }
 0x5cb   :  { %2288 = vmatprep.subr.bf16.mxu0 %v2287_v36 }
 0x5ce   :  { %2290 = vmatpush3.bf16.msra.mxu0 %v2287_v36  ;;  %v1616_v36 = vld [vmem:[%s3027_s21 + $0x8] sm:$0xff] }
 0x694   :  { %v2091_v59 = vpop.f32.mrb[12].mxu0 }
 0x695   :  { %v1035_v60 = vadd.f32 %v2091_v59, %v1848_v58  ;;  %v1029_v61 = vpop.f32.mrb[13].mxu0 }
 0x696   :  { %v1030_v62 = vadd.f32 %v1848_v58, %v1029_v61 }
 0x697   :  { %v1049_v63 = vmax.f32 %v1035_v60, 0.0 }
 0x698   :  { %v1048_v0 = vmax.f32 %v1030_v62, 0.0  ;;  %v2094_v1 = vpop.f32.mrb[14].mxu0 }
 0x699   :  { %v1057_v2 = vrot.slane %v1049_v63, 4  ;;  %v1045_v3 = vadd.f32 %v2094_v1, %v1848_v58  ;;  %1074 = vrot.lane.b32.xlu1 %v1049_v63, %s2345_s24  ;;  %v1039_v4 = vpop.f32.mrb[15].mxu0 }
 0x69a   :  { %v1056_v5 = vrot.slane %v1048_v0, 4  ;;  %v1040_v6 = vadd.f32 %v1848_v58, %v1039_v4  ;;  %1072 = vrot.lane.b32.xlu0 %v1048_v0, %s2345_s24  ;;  %v1385_v4 = vld [vmem:[%s3025_s17 + $0x10] sm:$0xff] }
 0x69b   :  { %v1051_v7 = vmax.f32 %v1045_v3, 0.0  ;;  %v1384_v3 = vld [vmem:[%s3025_s17 + $0x8] sm:$0xff] }
 0x69c   :  { %v1050_v8 = vmax.f32 %v1040_v6, 0.0  ;;  %v1058_v9 = vsel %vm891_vm13, %v1056_v5, %v1057_v2  ;;  %v1067_v16 = vsel %vm891_vm13, 0.0, %v1056_v5  ;;  %v1386_v6 = vld [vmem:[%s3025_s17 + $0x18] sm:$0xff] }
 0x69d   :  { %v1061_v10 = vrot.slane %v1051_v7, 4  ;;  %1078 = vrot.lane.b32.xlu1 %v1051_v7, %s2345_s24  ;;  %v1068_v19 = vsel %vm904_vm14, %v1067_v16, 0.0  ;;  %v2295_v7 = vpack.c.bf16 %v1386_v6, %v1385_v4  ;;  %v1858_v16 = vld [vmem:[%s3026_s16] ss:$0 sm:$0xff] }
 0x69e   :  { %v1059_v12 = vrot.slane %v1050_v8, 4  ;;  %1076 = vrot.lane.b32.xlu0 %v1050_v8, %s2345_s24  ;;  %v1387_v8 = vld [vmem:[%s3025_s17 + $0x20] sm:$0xff] }
 0x6a0   :  { %v1062_v13 = vsel %vm891_vm13, %v1059_v12, %v1061_v10  ;;  %v1060_v15 = vsel %vm891_vm13, %v1057_v2, %v1059_v12  ;;  %v1383_v2 = vld [vmem:[%s3025_s17] sm:$0xff]  ;;  %v1389_v12 = vld [vmem:[%s3025_s17 + $0x30] sm:$0xff] }
 0x6a1   :  { %v1070_v25 = vsel %vm906_vm15, %v1060_v15, 0.0  ;;  %v2291_v5 = vpack.c.bf16 %v1384_v3, %v1383_v2 }
 0x6a3   :  { %2292 = vmatprep.subr.bf16.mxu1 %v2291_v5 }
 0x70b   :  { %v1075_v17 = vpop.permute.xlu1 %1074 }
 0x70c   :  { %v1073_v18 = vpop.permute.xlu0 %1072  ;;  %v1085_v23 = vsel %vm328_vm9, %v1058_v9, %v1075_v17  ;;  %v1388_v9 = vld [vmem:[%s3025_s17 + $0x28] sm:$0xff] }
 0x70d   :  { %v1084_v21 = vsel %vm328_vm9, %v1068_v19, %v1073_v18  ;;  %v2299_v10 = vpack.c.bf16 %v1388_v9, %v1387_v8 }
 0x70e   :  { %2111 = vmatprep.mubr.msk.f32.mxu1 %vm348_vm10, %v1084_v21 }
 0x70f   :  { %v1079_v24 = vpop.permute.xlu1 %1078  ;;  %2112 = vmatmul.mubr.msk.f32.vlgmr.msra.gmra.mrb[8].mxu1 %vm348_vm10, %v1085_v23 }
 0x710   :  { %v1077_v52 = vpop.permute.xlu0 %1076  ;;  %v1087_v53 = vsel %vm328_vm9, %v1062_v13, %v1079_v24  ;;  %2294 = vmatpush3.bf16.msra.mxu1 %v2291_v5  ;;  %v1390_v13 = vld [vmem:[%s3025_s17 + $0x38] sm:$0xff] }
 0x711   :  { %v1086_v26 = vsel %vm328_vm9, %v1070_v25, %v1077_v52  ;;  %2296 = vmatprep.subr.bf16.mxu1 %v2295_v7  ;;  %v2303_v15 = vpack.c.bf16 %v1390_v13, %v1389_v12 }
 0x712   :  { %2114 = vmatprep.mubr.msk.f32.mxu1 %vm348_vm10, %v1086_v26 }
 0x713   :  { %2115 = vmatmul.mubr.msk.f32.gmra.mrb[10].mxu1 %vm348_vm10, %v1087_v53 }
 0x714   :  { %2298 = vmatpush3.bf16.msra.mxu1 %v2295_v7 }
 0x715   :  { %2300 = vmatprep.subr.bf16.mxu1 %v2299_v10 }
 0x718   :  { %2302 = vmatpush3.bf16.msra.mxu1 %v2299_v10 }
 0x719   :  { %2304 = vmatprep.subr.bf16.mxu1 %v2303_v15 }
 0x71c   :  { %2306 = vmatpush3.bf16.msra.mxu1 %v2303_v15 }
 0x7e2   :  { %v2113_v38 = vpop.f32.mrb[8].mxu1 }
 0x7e3   :  { %v1187_v39 = vadd.f32 %v2113_v38, %v1853_v37  ;;  %v1181_v40 = vpop.f32.mrb[9].mxu1  ;;  %v1507_v38 = vld [vmem:[%s3028_s19] sm:$0xff] }
 0x7e4   :  { %v1182_v41 = vadd.f32 %v1853_v37, %v1181_v40 }
 0x7e5   :  { %v1201_v42 = vmax.f32 %v1187_v39, 0.0  ;;  %v1508_v39 = vld [vmem:[%s3028_s19 + $0x8] sm:$0xff] }
 0x7e6   :  { %v1200_v43 = vmax.f32 %v1182_v41, 0.0  ;;  %v2116_v44 = vpop.f32.mrb[10].mxu1  ;;  %v2307_v40 = vpack.c.bf16 %v1508_v39, %v1507_v38  ;;  %v1617_v41 = vld [vmem:[%s3027_s21 + $0x10] sm:$0xff] }
 0x7e7   :  { %v2831_v45 = vadd.f32 %v1201_v42, %v2716_v20  ;;  %v1197_v47 = vadd.f32 %v2116_v44, %v1853_v37  ;;  %v1191_v49 = vpop.f32.mrb[11].mxu1  ;;  %v1618_v42 = vld [vmem:[%s3027_s21 + $0x18] sm:$0xff]  ;;  %s2346_s21 = smov 2  }
 0x7e8   :  { %v1204_v50 = vadd.f32 %v1200_v43, %v2718_v22  ;;  %v1192_v51 = vadd.f32 %v1853_v37, %v1191_v49  ;;  %v2315_v37 = vpack.c.bf16 %v1616_v36, %v1615_v35  ;;  %2308 = vmatprep.subr.bf16.mxu0 %v2307_v40  ;;  %v1509_v43 = vld [vmem:[%s3028_s19 + $0x10] sm:$0xff]  ;;  %v2319_v44 = vpack.c.bf16 %v1618_v42, %v1617_v41 }
 0x7e9   :  { %v1209_v54 = vmax.f32 %v2831_v45, 0.0  ;;  %v1203_v55 = vmax.f32 %v1197_v47, 0.0  ;;  %v1510_v47 = vld [vmem:[%s3028_s19 + $0x18] sm:$0xff] }
 0x7ea   :  { %v2835_v56 = vmax.f32 %v1204_v50, 0.0  ;;  %v1202_v57 = vmax.f32 %v1192_v51, 0.0  ;;  %2316 = vmatprep.subr.bf16.mxu1 %v2315_v37  ;;  %v2311_v49 = vpack.c.bf16 %v1510_v47, %v1509_v43  ;;  %v1863_v50 = vld [vmem:[%s3029_s18] ss:$0 sm:$0xff] }
 0x7eb   :  { %v2838_v58 = vadd.f32 %v1203_v55, %v2726_v46  ;;  %1230 = vrot.lane.b32.xlu1 %v1209_v54, %s2345_s24 }
 0x7ec   :  { %v1206_v20 = vadd.f32 %v1202_v57, %v2728_v48  ;;  %1228 = vrot.lane.b32.xlu0 %v2835_v56, %s2345_s24 }
 0x7ed   :  { %v1211_v22 = vmax.f32 %v2838_v58, 0.0 }
 0x7ee   :  { %v2847_v59 = vmax.f32 %v1206_v20, 0.0 }
 0x7ef   :  { %1234 = vrot.lane.b32.xlu1 %v1211_v22, %s2345_s24 }
 0x7f0   :  { %1232 = vrot.lane.b32.xlu0 %v2847_v59, %s2345_s24 }
 0x85d   :  { %v1231_v46 = vpop.permute.xlu1 %1230 }
 0x85e   :  { %v1229_v60 = vpop.permute.xlu0 %1228  ;;  %v1241_v48 = vsel %vm328_vm9, %v2835_v56, %v1231_v46 }
 0x85f   :  { %v1240_v61 = vsel %vm328_vm9, 0.0, %v1229_v60 }
 0x860   :  { %2133 = vmatprep.mubr.msk.f32.mxu0 %vm348_vm10, %v1240_v61 }
 0x861   :  { %v1235_v62 = vpop.permute.xlu1 %1234  ;;  %2134 = vmatmul.mubr.msk.f32.vlgmr.msra.gmra.mrb[16].mxu0 %vm348_vm10, %v1241_v48 }
 0x862   :  { %v1233_v63 = vpop.permute.xlu0 %1232  ;;  %v1243_v1 = vsel %vm328_vm9, %v2847_v59, %v1235_v62  ;;  %2310 = vmatpush3.bf16.msra.mxu0 %v2307_v40 }
 0x863   :  { %v1242_v0 = vsel %vm328_vm9, 0.0, %v1233_v63  ;;  %2312 = vmatprep.subr.bf16.mxu0 %v2311_v49 }
 0x864   :  { %2136 = vmatprep.mubr.msk.f32.mxu0 %vm348_vm10, %v1242_v0 }
 0x865   :  { %2137 = vmatmul.mubr.msk.f32.gmra.mrb[18].mxu0 %vm348_vm10, %v1243_v1 }
 0x866   :  { %2314 = vmatpush3.bf16.msra.mxu0 %v2311_v49 }
 0x934   :  { %v2135_v17 = vpop.f32.mrb[16].mxu0 }
 0x935   :  { %v1343_v18 = vadd.f32 %v2135_v17, %v1858_v16  ;;  %v1337_v19 = vpop.f32.mrb[17].mxu0 }
 0x936   :  { %v1338_v21 = vadd.f32 %v1858_v16, %v1337_v19 }
 0x937   :  { %v1357_v23 = vmax.f32 %v1343_v18, 0.0 }
 0x938   :  { %v1356_v24 = vmax.f32 %v1338_v21, 0.0  ;;  %v2138_v25 = vpop.f32.mrb[18].mxu0 }
 0x939   :  { %v1353_v52 = vadd.f32 %v2138_v25, %v1858_v16  ;;  %1369 = vrot.lane.b32.xlu1 %v1357_v23, %s2345_s24  ;;  %v1347_v26 = vpop.f32.mrb[19].mxu0 }
 0x93a   :  { %v1348_v53 = vadd.f32 %v1858_v16, %v1347_v26  ;;  %1367 = vrot.lane.b32.xlu0 %v1356_v24, %s2345_s24 }
 0x93b   :  { %v1359_v11 = vmax.f32 %v1353_v52, 0.0 }
 0x93c   :  { %v1358_v27 = vmax.f32 %v1348_v53, 0.0 }
 0x93d   :  { %1373 = vrot.lane.b32.xlu1 %v1359_v11, %s2345_s24 }
 0x93e   :  { %1371 = vrot.lane.b32.xlu0 %v1358_v27, %s2345_s24 }
 0x9ab   :  { %v1370_v14 = vpop.permute.xlu1 %1369 }
 0x9ac   :  { %v1368_v28 = vpop.permute.xlu0 %1367  ;;  %v1380_v30 = vsel %vm328_vm9, %v1356_v24, %v1370_v14 }
 0x9ad   :  { %v1379_v29 = vsel %vm328_vm9, 0.0, %v1368_v28 }
 0x9ae   :  { %2155 = vmatprep.mubr.msk.f32.mxu1 %vm348_vm10, %v1379_v29 }
 0x9af   :  { %v1374_v31 = vpop.permute.xlu1 %1373  ;;  %2156 = vmatmul.mubr.msk.f32.vlgmr.msra.gmra.mrb[12].mxu1 %vm348_vm10, %v1380_v30 }
 0x9b0   :  { %v1372_v32 = vpop.permute.xlu0 %1371  ;;  %v1382_v34 = vsel %vm328_vm9, %v1358_v27, %v1374_v31  ;;  %2318 = vmatpush3.bf16.msra.mxu1 %v2315_v37 }
 0x9b1   :  { %v1381_v33 = vsel %vm328_vm9, 0.0, %v1372_v32  ;;  %2320 = vmatprep.subr.bf16.mxu1 %v2319_v44 }
 0x9b2   :  { %2158 = vmatprep.mubr.msk.f32.mxu1 %vm348_vm10, %v1381_v33 }
 0x9b3   :  { %2159 = vmatmul.mubr.msk.f32.gmra.mrb[14].mxu1 %vm348_vm10, %v1382_v34 }
 0x9b4   :  { %2322 = vmatpush3.bf16.msra.mxu1 %v2319_v44 }
 0xa82   :  { %v2157_v51 = vpop.f32.mrb[12].mxu1 }
 0xa83   :  { %v1482_v55 = vadd.f32 %v2157_v51, %v1863_v50  ;;  %v1476_v57 = vpop.f32.mrb[13].mxu1 }
 0xa84   :  { %v1477_v20 = vadd.f32 %v1863_v50, %v1476_v57 }
 0xa85   :  { %v1496_v46 = vmax.f32 %v1482_v55, 0.0 }
 0xa86   :  { %v1495_v60 = vmax.f32 %v1477_v20, 0.0  ;;  %v2160_v61 = vpop.f32.mrb[14].mxu1 }
 0xa87   :  { %v1500_v48 = vadd.f32 %v1496_v46, %v1209_v54  ;;  %v1492_v62 = vadd.f32 %v2160_v61, %v1863_v50  ;;  %v1486_v63 = vpop.f32.mrb[15].mxu1 }
 0xa88   :  { %v1499_v0 = vadd.f32 %v1495_v60, %v2835_v56  ;;  %v1487_v1 = vadd.f32 %v1863_v50, %v1486_v63  ;;  %v1873_v56 = vld [vmem:[%s3030_s22] ss:$0 sm:$0xff] }
 0xa89   :  { %v1498_v2 = vmax.f32 %v1492_v62, 0.0  ;;  %v1504_v5 = vmax.f32 %v1500_v48, 0.0 }
 0xa8a   :  { %v1503_v3 = vmax.f32 %v1499_v0, 0.0  ;;  %v1497_v4 = vmax.f32 %v1487_v1, 0.0 }
 0xa8b   :  { %v1502_v6 = vadd.f32 %v1498_v2, %v1211_v22 }
 0xa8c   :  { %v1501_v7 = vadd.f32 %v1497_v4, %v2847_v59  ;;  %2169 = vmatprep.mubr.msk.f32.mxu0 %vm328_vm9, %v1503_v3  ;;  %2183 = vmatprep.mubr.msk.f32.mxu1 %vm328_vm9, %v1503_v3 }
 0xa8d   :  { %2170 = vmatmul.mubr.msk.f32.vlgmr.msra.gmra.mrb[20].mxu0 %vm328_vm9, %v1504_v5  ;;  %2184 = vmatmul.mubr.msk.f32.vlgmr.msra.gmra.mrb[16].mxu1 %vm328_vm9, %v1504_v5  ;;  %v1506_v54 = vmax.f32 %v1502_v6, 0.0 }
 0xa8e   :  { %v1505_v45 = vmax.f32 %v1501_v7, 0.0 }
 0xa90   :  { %2172 = vmatprep.mubr.msk.f32.mxu0 %vm328_vm9, %v1505_v45  ;;  %2186 = vmatprep.mubr.msk.f32.mxu1 %vm328_vm9, %v1505_v45 }
 0xa91   :  { %2173 = vmatmul.mubr.msk.f32.gmra.mrb[22].mxu0 %vm328_vm9, %v1506_v54  ;;  %2187 = vmatmul.mubr.msk.f32.gmra.mrb[18].mxu1 %vm328_vm9, %v1506_v54  ;;  %vm1812_vm9 = vcmask 31744  }
 0xb60   :  { %v2947_v58 = vpop.f32.mrb[20].mxu0  ;;  %v2185_v22 = vpop.f32.mrb[16].mxu1 }
 0xb61   :  { %v2949_v59 = vadd.f32 %v2185_v22, %v1873_v56  ;;  %v2951_v8 = vpop.f32.mrb[21].mxu0  ;;  %v1692_v9 = vpop.f32.mrb[17].mxu1 }
 0xb62   :  { %v2953_v10 = vadd.f32 %v1873_v56, %v1692_v9 }
 0xb63   :  { %v1724_v12 = vand.u32 2147483647, %v2949_v59  ;;  %v1712_v49 = vmax.f32 %v2949_v59, 0.0  ;;  %vm1716_vm0 = vcmp.ne.f32.partialorder %v2949_v59, %v2949_v59 }
 0xb64   :  { %v1723_v13 = vand.u32 2147483647, %v2953_v10  ;;  %v2957_v15 = vpop.f32.mrb[22].mxu0  ;;  %v2188_v16 = vpop.f32.mrb[18].mxu1  ;;  %v1711_v48 = vmax.f32 %v2953_v10, 0.0  ;;  %vm1715_vm3 = vcmp.ne.f32.partialorder %v2953_v10, %v2953_v10 }
 0xb65   :  { %v1728_v17 = vsub.f32 0.0, %v1724_v12  ;;  %v2959_v18 = vadd.f32 %v2188_v16, %v1873_v56  ;;  %v2961_v19 = vpop.f32.mrb[23].mxu0  ;;  %v1702_v21 = vpop.f32.mrb[19].mxu1 }
 0xb66   :  { %v1727_v23 = vsub.f32 0.0, %v1723_v13  ;;  %v2963_v24 = vadd.f32 %v1873_v56, %v1702_v21 }
 0xb67   :  { %v1733_v25 = vmul.f32 1.442695, %v1728_v17  ;;  %v1726_v52 = vand.u32 2147483647, %v2959_v18  ;;  %v1714_v1 = vmax.f32 %v2959_v18, 0.0  ;;  %vm1718_vm6 = vcmp.ne.f32.partialorder %v2959_v18, %v2959_v18 }
 0xb68   :  { %v1731_v26 = vmul.f32 1.442695, %v1727_v23  ;;  %v1725_v53 = vand.u32 2147483647, %v2963_v24  ;;  %v1713_v5 = vmax.f32 %v2963_v24, 0.0  ;;  %vm1717_vm7 = vcmp.ne.f32.partialorder %v2963_v24, %v2963_v24 }
 0xb69   :  { %2327 = vpow2.f32 %v1733_v25  ;;  %v1730_v11 = vsub.f32 0.0, %v1726_v52 }
 0xb6a   :  { %2329 = vpow2.f32 %v1731_v26  ;;  %v1729_v27 = vsub.f32 0.0, %v1725_v53 }
 0xb6b   :  { %v1737_v14 = vmul.f32 1.442695, %v1730_v11 }
 0xb6c   :  { %v1735_v28 = vmul.f32 1.442695, %v1729_v27 }
 0xb6d   :  { %2331 = vpow2.f32 %v1737_v14  ;;  %v1868_v14 = vld [vmem:[%s3031_s20] ss:$0 sm:$0xff] }
 0xb6e   :  { %2333 = vpow2.f32 %v1735_v28  ;;  %v1597_v28 = vadd.f32 %v1868_v14, %v2951_v8 }
 0xb73   :  { %v2328_v29 = vpop.eup %2327 }
 0xb74   :  { %v2330_v30 = vpop.eup %2329  ;;  %v1748_v31 = vadd.f32 1.0, %v2328_v29  ;;  %v1751_v36 = vmul.f32 -0.5, %v2328_v29  ;;  %v1754_v40 = vand.u32 2147483647, %v2328_v29 }
 0xb75   :  { %v1739_v32 = vadd.f32 1.0, %v2330_v30  ;;  %v1742_v38 = vmul.f32 -0.5, %v2330_v30  ;;  %v1745_v44 = vand.u32 2147483647, %v2330_v30 }
 0xb76   :  { %2335 = vlog2.f32 %v1748_v31  ;;  %v1752_v39 = vadd.f32 1.0, %v1751_v36  ;;  %vm1755_vm1 = vcmp.lt.f32.partialorder %v1754_v40, 0.0004427343 }
 0xb77   :  { %v2332_v33 = vpop.eup %2331  ;;  %2337 = vlog2.f32 %v1739_v32  ;;  %v1743_v42 = vadd.f32 1.0, %v1742_v38  ;;  %vm1746_vm2 = vcmp.lt.f32.partialorder %v1745_v44, 0.0004427343  ;;  %v1612_v32 = vadd.f32 %v2957_v15, %v1868_v14 }
 0xb78   :  { %v2334_v34 = vpop.eup %2333  ;;  %v1766_v35 = vadd.f32 1.0, %v2332_v33  ;;  %v1769_v41 = vmul.f32 -0.5, %v2332_v33  ;;  %v1753_v55 = vmul.f32 %v2328_v29, %v1752_v39  ;;  %v1772_v60 = vand.u32 2147483647, %v2332_v33 }
 0xb79   :  { %v1757_v37 = vadd.f32 1.0, %v2334_v34  ;;  %v1760_v43 = vmul.f32 -0.5, %v2334_v34  ;;  %v1744_v46 = vmul.f32 %v2330_v30, %v1743_v42  ;;  %v1763_v63 = vand.u32 2147483647, %v2334_v34 }
 0xb7a   :  { %2339 = vlog2.f32 %v1766_v35  ;;  %v1770_v57 = vadd.f32 1.0, %v1769_v41  ;;  %vm1773_vm4 = vcmp.lt.f32.partialorder %v1772_v60, 0.0004427343 }
 0xb7b   :  { %2341 = vlog2.f32 %v1757_v37  ;;  %v1761_v61 = vadd.f32 1.0, %v1760_v43  ;;  %vm1764_vm5 = vcmp.lt.f32.partialorder %v1763_v63, 0.0004427343 }
 0xb7c   :  { %v1771_v45 = vmul.f32 %v2332_v33, %v1770_v57 }
 0xb7d   :  { %v1762_v22 = vmul.f32 %v2334_v34, %v1761_v61 }
 0xb80   :  { %v2336_v47 = vpop.eup %2335 }
 0xb81   :  { %v2338_v50 = vpop.eup %2337  ;;  %v1750_v51 = vmul.f32 0.6931472, %v2336_v47 }
 0xb82   :  { %v1741_v20 = vmul.f32 0.6931472, %v2338_v50 }
 0xb83   :  { %v1756_v62 = vsel %vm1755_vm1, %v1753_v55, %v1750_v51 }
 0xb84   :  { %v2340_v0 = vpop.eup %2339  ;;  %v1776_v2 = vadd.f32 %v1756_v62, %v1712_v49  ;;  %v1747_v3 = vsel %vm1746_vm2, %v1744_v46, %v1741_v20 }
 0xb85   :  { %v2342_v4 = vpop.eup %2341  ;;  %v1775_v6 = vadd.f32 %v1747_v3, %v1711_v48  ;;  %v1768_v7 = vmul.f32 0.6931472, %v2340_v0 }
 0xb86   :  { %v1780_v54 = vsel %vm1716_vm0, %v2949_v59, %v1776_v2  ;;  %v1759_v56 = vmul.f32 0.6931472, %v2342_v4 }
 0xb87   :  { %v1784_v9 = vmul.f32 0.99, %v1780_v54  ;;  %v1779_v12 = vsel %vm1715_vm3, %v2953_v10, %v1775_v6  ;;  %v1774_v13 = vsel %vm1773_vm4, %v1771_v45, %v1768_v7 }
 0xb88   :  { %v1783_v16 = vmul.f32 0.99, %v1779_v12  ;;  %v1778_v17 = vadd.f32 %v1774_v13, %v1714_v1  ;;  %v1765_v21 = vsel %vm1764_vm5, %v1762_v22, %v1759_v56 }
 0xb89   :  { %v1788_v23 = vadd.f32 0.01, %v1784_v9  ;;  %v1777_v25 = vadd.f32 %v1765_v21, %v1713_v5 }
 0xb8a   :  { %v1787_v52 = vadd.f32 0.01, %v1783_v16  ;;  %v1782_v26 = vsel %vm1718_vm6, %v2959_v18, %v1778_v17  ;;  %v1602_v18 = vadd.f32 %v2947_v58, %v1868_v14  ;;  %v1607_v58 = vadd.f32 %v1868_v14, %v2961_v19 }
 0xb8b   :  { %1797 = vrot.lane.b32.xlu1 %v1788_v23, %s2346_s21  ;;  %v1786_v59 = vmul.f32 0.99, %v1782_v26  ;;  %v1781_v10 = vsel %vm1717_vm7, %v2963_v24, %v1777_v25 }
 0xb8c   :  { %1795 = vrot.lane.b32.xlu0 %v1787_v52, %s2346_s21  ;;  %v1785_v53 = vmul.f32 0.99, %v1781_v10 }
 0xb8d   :  { %v1790_v11 = vadd.f32 0.01, %v1786_v59 }
 0xb8e   :  { %v1789_v27 = vadd.f32 0.01, %v1785_v53 }
 0xb8f   :  { %1801 = vrot.lane.b32.xlu1 %v1790_v11, %s2346_s21 }
 0xb90   :  { %1799 = vrot.lane.b32.xlu0 %v1789_v27, %s2346_s21 }
 0xbfd   :  { %v1798_v29 = vpop.permute.xlu1 %1797 }
 0xbfe   :  { %v1809_v30 = vsel %vm1807_vm8, %v1602_v18, %v1798_v29  ;;  %v1796_v24 = vpop.permute.xlu0 %1795 }
 0xbff   :  { %1814 = vst.msk [vmem:[%s3032_s23 + $0x8] sm:$0xff] %vm1812_vm9, %v1809_v30  ;;  %v1808_v31 = vsel %vm1807_vm8, %v1597_v28, %v1796_v24 }
 0xc00   :  { %1813 = vst.msk [vmem:[%s3032_s23] sm:$0xff] %vm1812_vm9, %v1808_v31 }
 0xc01   :  { %v1802_v33 = vpop.permute.xlu1 %1801 }
 0xc02   :  { %v1811_v8 = vsel %vm1807_vm8, %v1612_v32, %v1802_v33  ;;  %v1800_v34 = vpop.permute.xlu0 %1799 }
 0xc03   :  { %1816 = vst.msk [vmem:[%s3032_s23 + $0x18] sm:$0xff] %vm1812_vm9, %v1811_v8  ;;  %v1810_v35 = vsel %vm1807_vm8, %v1607_v58, %v1800_v34 }
 0xc04   :  { %1815 = vst.msk [vmem:[%s3032_s23 + $0x10] sm:$0xff] %vm1812_vm9, %v1810_v35 }

</bundles_post_ra>
